<compile_context>
chip_gen: v7x
topology: tpu7x:2x2x1
jax: 0.10.0
libtpu: 0.0.40
codegen_flags: <defaults>
</compile_context>

<pallas_src>
import jax
import jax.numpy as jnp
from jax.experimental import pallas as pl
from jax.experimental.pallas import tpu as pltpu


ROW_TILE = 256   # multiple of 256: full MXU pushes on v6e/v7x, perfect fit on v5e


def _round_up(x, m):
    return ((x + m - 1) // m) * m


def _vmem_budget_bytes():
    """Scoped-VMEM budget: ~75% of physical VMEM (v7x: ~48 MiB, v5e/v6e: 96 MiB)."""
    try:
        cap = pltpu.get_tpu_info().vmem_capacity_bytes
    except Exception:
        cap = 64 * 1024 * 1024          # v7x-safe fallback
    return min((cap * 3) // 4, 96 * 1024 * 1024)


# ============================================================================
# Fused path: both GCN layers + fc head in one pallas_call, A resident in VMEM
# grid = (phase, row tile); phase 0 writes G = leaky(A@XW1+b1) @ W2 into a
# VMEM scratch, phase 1 sweeps A @ G, applies the head, writes (t,1) logits.
# ============================================================================
def _gcn_fused_kernel(a_hbm, xw1_ref, b1_ref, w2_ref, b2_ref, wf_ref, bf_ref,
                      o_ref, a_vmem, g_ref, sem):
    p = pl.program_id(0)                 # phase
    i = pl.program_id(1)                 # row tile
    t = o_ref.shape[1]                   # row-tile size (block is (1, t, 1))
    row0 = pl.multiple_of(i * t, t)

    # DMA the whole (padded, bf16) adjacency into VMEM exactly once.
    @pl.when(jnp.logical_and(p == 0, i == 0))
    def _():
        cp = pltpu.make_async_copy(a_hbm, a_vmem, sem)
        cp.start()
        cp.wait()

    @pl.when(p == 0)
    def _():
        a_rows = a_vmem[pl.ds(row0, t), :]                       # (t, n_pad) bf16
        h = jnp.dot(a_rows, xw1_ref[...],
                    preferred_element_type=jnp.float32) + b1_ref[...]
        h = jnp.where(h > 0, h, 0.2 * h)                         # leaky_relu(0.2)
        # dropout: identity (eval mode)
        # Fold layer-2's lin: G = H1 @ W2 (bf16 MXU, f32 acc).
        g_ref[pl.ds(row0, t), :] = jnp.dot(
            h.astype(jnp.bfloat16), w2_ref[...],
            preferred_element_type=jnp.float32).astype(g_ref.dtype)
        o_ref[...] = jnp.zeros_like(o_ref)   # phase-0 output slab is discarded

    @pl.when(p == 1)
    def _():
        a_rows = a_vmem[pl.ds(row0, t), :]                       # (t, n_pad) bf16
        h2 = jnp.dot(a_rows, g_ref[...],
                     preferred_element_type=jnp.float32) + b2_ref[...]
        h2 = jnp.where(h2 > 0, h2, 0.2 * h2)                     # leaky_relu(0.2)
        # dropout: identity (eval mode)
        # fc head (hidden -> 1): VPU multiply + cross-lane reduce, SMEM bias.
        logit = jnp.sum(h2 * wf_ref[...], axis=-1, keepdims=True) + bf_ref[0, 0]
        o_ref[...] = jax.nn.sigmoid(logit)[None, :, :]


# ============================================================================
# Tiled fallback path (A too large for VMEM): two pallas_calls.
# ============================================================================
def _gcn_layer1_kernel(a_ref, xw1_ref, b1_ref, w2_ref, g_ref, acc_ref):
    """G = leaky_relu(A @ XW1 + b1) @ W2   (layer-2 lin folded into finalize)."""
    k = pl.program_id(1)

    @pl.when(k == 0)
    def _():
        acc_ref[...] = jnp.zeros_like(acc_ref)

    acc_ref[...] += jnp.dot(a_ref[...], xw1_ref[...],
                            preferred_element_type=jnp.float32)

    @pl.when(k == pl.num_programs(1) - 1)
    def _():
        h = acc_ref[...] + b1_ref[...]
        h = jnp.where(h > 0, h, 0.2 * h)                         # leaky_relu(0.2)
        # dropout: identity (eval mode)
        g_ref[...] = jnp.dot(h.astype(jnp.bfloat16), w2_ref[...],
                             preferred_element_type=jnp.float32).astype(g_ref.dtype)


def _gcn_layer2_head_kernel(a_ref, g_ref, b2_ref, wf_ref, bf_ref, o_ref, acc_ref):
    """y = sigmoid(leaky_relu(A @ G + b2) @ wf + bf), output (t, 1) f32."""
    k = pl.program_id(1)

    @pl.when(k == 0)
    def _():
        acc_ref[...] = jnp.zeros_like(acc_ref)

    acc_ref[...] += jnp.dot(a_ref[...], g_ref[...],
                            preferred_element_type=jnp.float32)

    @pl.when(k == pl.num_programs(1) - 1)
    def _():
        h = acc_ref[...] + b2_ref[...]
        h = jnp.where(h > 0, h, 0.2 * h)                         # leaky_relu(0.2)
        # dropout: identity (eval mode)
        logit = jnp.sum(h * wf_ref[...], axis=-1, keepdims=True) + bf_ref[0, 0]
        o_ref[...] = jax.nn.sigmoid(logit)


# ============================================================================
# Wrappers
# ============================================================================
def _pick_k_tile(n_pad, cap):
    """Largest multiple of 256 that divides n_pad and is <= cap (min 256)."""
    best = 256
    d = 256
    while d <= min(n_pad, cap):
        if n_pad % d == 0:
            best = d
        d += 256
    return best


def _forward_fused(a_pad, xw1_p, b1_r, w2_b, b2_r, wf_r, bf_s, *,
                   n, n_pad, hidden, vmem_limit):
    t = ROW_TILE
    grid = (2, n_pad // t)     # (phase, row tile); phase 0 fully precedes phase 1
    out = pl.pallas_call(
        _gcn_fused_kernel,
        out_shape=jax.ShapeDtypeStruct((2, n_pad, 1), jnp.float32),
        grid_spec=pltpu.PrefetchScalarGridSpec(
            num_scalar_prefetch=0,
            grid=grid,
            in_specs=[
                pl.BlockSpec(memory_space=pl.ANY),                    # A in HBM (manual DMA)
                pl.BlockSpec((n_pad, hidden), lambda p, i: (0, 0)),   # XW1 (resident)
                pl.BlockSpec((1, hidden), lambda p, i: (0, 0)),       # b1
                pl.BlockSpec((hidden, hidden), lambda p, i: (0, 0)),  # W2
                pl.BlockSpec((1, hidden), lambda p, i: (0, 0)),       # b2
                pl.BlockSpec((1, hidden), lambda p, i: (0, 0)),       # wf (row)
                pl.BlockSpec((1, 1), lambda p, i: (0, 0),
                             memory_space=pltpu.MemorySpace.SMEM),    # bf scalar
            ],
            out_specs=pl.BlockSpec((1, t, 1), lambda p, i: (p, i, 0)),
            scratch_shapes=[
                pltpu.VMEM((n_pad, n_pad), jnp.bfloat16),   # A, resident for both layers
                pltpu.VMEM((n_pad, hidden), jnp.bfloat16),  # G = leaky(A@XW1+b1) @ W2
                pltpu.SemaphoreType.DMA(()),
            ],
        ),
        compiler_params=pltpu.CompilerParams(
            # Phase 1 reads row tiles written in phase 0 through shared VMEM
            # scratch -> both grid axes must run sequentially on one core.
            dimension_semantics=("arbitrary", "arbitrary"),
            vmem_limit_bytes=vmem_limit,
        ),
    )(a_pad, xw1_p, b1_r, w2_b, b2_r, wf_r, bf_s)
    return out[1, :n, :]


def _forward_tiled(a_pad, xw1_p, b1_r, w2_b, b2_r, wf_r, bf_s, *,
                   n, n_pad, hidden, vmem_limit, max_k_tile):
    t = ROW_TILE
    kt = _pick_k_tile(n_pad, max_k_tile)
    grid = (n_pad // t, n_pad // kt)
    cparams = pltpu.CompilerParams(
        dimension_semantics=("parallel", "arbitrary"),
        vmem_limit_bytes=vmem_limit,
    )

    # Layer 1 (+ layer-2 lin):  G = leaky_relu(A @ XW1 + b1) @ W2
    g = pl.pallas_call(
        _gcn_layer1_kernel,
        out_shape=jax.ShapeDtypeStruct((n_pad, hidden), jnp.bfloat16),
        grid_spec=pltpu.PrefetchScalarGridSpec(
            num_scalar_prefetch=0,
            grid=grid,
            in_specs=[
                pl.BlockSpec((t, kt), lambda i, k: (i, k)),           # A (big stream)
                pl.BlockSpec((kt, hidden), lambda i, k: (k, 0)),      # XW1 rows
                pl.BlockSpec((1, hidden), lambda i, k: (0, 0)),       # b1
                pl.BlockSpec((hidden, hidden), lambda i, k: (0, 0)),  # W2
            ],
            out_specs=pl.BlockSpec((t, hidden), lambda i, k: (i, 0)),
            scratch_shapes=[pltpu.VMEM((t, hidden), jnp.float32)],
        ),
        compiler_params=cparams,
    )(a_pad, xw1_p, b1_r, w2_b)

    # Layer 2 + fc head: y = sigmoid(leaky_relu(A @ G + b2) . wf + bf)
    out = pl.pallas_call(
        _gcn_layer2_head_kernel,
        out_shape=jax.ShapeDtypeStruct((n_pad, 1), jnp.float32),
        grid_spec=pltpu.PrefetchScalarGridSpec(
            num_scalar_prefetch=0,
            grid=grid,
            in_specs=[
                pl.BlockSpec((t, kt), lambda i, k: (i, k)),           # A (big stream)
                pl.BlockSpec((kt, hidden), lambda i, k: (k, 0)),      # G rows
                pl.BlockSpec((1, hidden), lambda i, k: (0, 0)),       # b2
                pl.BlockSpec((1, hidden), lambda i, k: (0, 0)),       # wf (row)
                pl.BlockSpec((1, 1), lambda i, k: (0, 0),
                             memory_space=pltpu.MemorySpace.SMEM),    # bf scalar
            ],
            out_specs=pl.BlockSpec((t, 1), lambda i, k: (i, 0)),
            scratch_shapes=[pltpu.VMEM((t, hidden), jnp.float32)],
        ),
        compiler_params=cparams,
    )(a_pad, g, b2_r, wf_r, bf_s)
    return out[:n, :]


def gcn_forward_pallas(a_hat_pad, x, w1, b1, w2, b2, wf, bf, *,
                       force_tiled=False, max_k_tile=2048):
    """MyGCNModel forward.

    a_hat_pad: (n_pad, n_pad) bf16 GCN-normalized dense adjacency, zero-padded
               to a multiple of 256 (see build_norm_adj).
    Returns (num_nodes, 1) f32 probabilities.
    """
    n, _ = x.shape
    hidden = w1.shape[1]
    n_pad = a_hat_pad.shape[0]
    assert a_hat_pad.shape == (n_pad, n_pad) and a_hat_pad.dtype == jnp.bfloat16
    assert n_pad % ROW_TILE == 0 and n_pad >= n

    # Fold W1 into the sweep: XW1 = X @ W1 once (N x F x H, trivial), f32 then a
    # single bf16 cast.  Matches GCNConv lin-then-propagate ordering exactly.
    xw1 = (x.astype(jnp.float32) @ w1.astype(jnp.float32)).astype(jnp.bfloat16)
    xw1_p = jnp.pad(xw1, ((0, n_pad - n), (0, 0)))

    b1_r = b1.reshape(1, hidden).astype(jnp.float32)
    b2_r = b2.reshape(1, hidden).astype(jnp.float32)
    w2_b = w2.astype(jnp.bfloat16)
    wf_r = wf.reshape(1, hidden).astype(jnp.float32)
    bf_s = bf.reshape(1, 1).astype(jnp.float32)

    vmem_budget = _vmem_budget_bytes()
    # Fused footprint: resident A + G scratch + double-buffered XW1 + slack.
    fused_bytes = (2 * n_pad * n_pad
                   + 2 * n_pad * hidden
                   + 2 * 2 * n_pad * hidden
                   + (1 << 21))
    use_fused = (not force_tiled) and fused_bytes <= vmem_budget - (8 << 20)

    if use_fused:
        return _forward_fused(a_hat_pad, xw1_p, b1_r, w2_b, b2_r, wf_r, bf_s,
                              n=n, n_pad=n_pad, hidden=hidden,
                              vmem_limit=vmem_budget)
    return _forward_tiled(a_hat_pad, xw1_p, b1_r, w2_b, b2_r, wf_r, bf_s,
                          n=n, n_pad=n_pad, hidden=hidden,
                          vmem_limit=vmem_budget, max_k_tile=max_k_tile)


# ----------------------------------------------------------------------------
# Glue: densify edge_index / edge_weight into the GCN-normalized adjacency
# (gcn_norm + add_self_loops, as in torch_geometric GCNConv), built *already*
# zero-padded and cast to bf16 exactly once.
# ----------------------------------------------------------------------------
def build_norm_adj(edge_index, edge_weight, num_nodes, n_pad=None):
    if n_pad is None:
        n_pad = _round_up(num_nodes, ROW_TILE)
    src = edge_index[0]
    dst = edge_index[1]
    loop = jnp.arange(num_nodes, dtype=src.dtype)
    src = jnp.concatenate([src, loop])
    dst = jnp.concatenate([dst, loop])
    w = jnp.concatenate([edge_weight,
                         jnp.ones((num_nodes,), dtype=edge_weight.dtype)])
    deg = jnp.zeros((num_nodes,), dtype=w.dtype).at[dst].add(w)
    deg_inv_sqrt = jnp.where(deg > 0, 1.0 / jnp.sqrt(deg), 0.0)
    norm = deg_inv_sqrt[src] * w * deg_inv_sqrt[dst]
    # messages flow src -> dst: out = A_hat @ X with A_hat[dst, src] += norm;
    # padded rows/cols stay exactly zero (required so padded garbage is inert).
    a_hat = jnp.zeros((n_pad, n_pad), jnp.float32).at[dst, src].add(norm)
    return a_hat.astype(jnp.bfloat16)


# ----------------------------------------------------------------------------
# Deterministic parameter init (shapes from MyGCNModel.__init__)
# ----------------------------------------------------------------------------
def init_params(key, num_features, hidden_channels):
    k1, k2, k3 = jax.random.split(key, 3)

    def glorot(k, shape):
        lim = jnp.sqrt(6.0 / (shape[0] + shape[1]))
        return jax.random.uniform(k, shape, jnp.float32, -lim, lim)

    w1 = glorot(k1, (num_features, hidden_channels))
    b1 = jnp.zeros((1, hidden_channels), jnp.float32)
    w2 = glorot(k2, (hidden_channels, hidden_channels))
    b2 = jnp.zeros((1, hidden_channels), jnp.float32)
    wf = glorot(k3, (hidden_channels, 1))
    bf = jnp.zeros((1, 1), jnp.float32)
    return w1, b1, w2, b2, wf, bf


# Pure-JAX f32 reference (same math, no bf16) for validation.
def gcn_forward_ref(a_hat, x, w1, b1, w2, b2, wf, bf):
    h = a_hat @ (x @ w1) + b1
    h = jnp.where(h > 0, h, 0.2 * h)
    h = a_hat @ (h @ w2) + b2
    h = jnp.where(h > 0, h, 0.2 * h)
    return jax.nn.sigmoid(h @ wf + bf)


if __name__ == "__main__":
    def run_case(key, num_nodes, num_features, hidden, num_edges,
                 force_tiled, max_k_tile=2048):
        kx, ke, kw, kp = jax.random.split(key, 4)
        x = jax.random.normal(kx, (num_nodes, num_features), jnp.float32)
        edge_index = jax.random.randint(ke, (2, num_edges), 0, num_nodes, jnp.int32)
        edge_weight = jax.random.uniform(kw, (num_edges,), jnp.float32, 0.1, 1.0)
        w1, b1, w2, b2, wf, bf = init_params(kp, num_features, hidden)

        n_pad = _round_up(num_nodes, ROW_TILE)
        a_pad = build_norm_adj(edge_index, edge_weight, num_nodes, n_pad)

        out = gcn_forward_pallas(a_pad, x, w1, b1, w2, b2, wf, bf,
                                 force_tiled=force_tiled, max_k_tile=max_k_tile)
        out = jax.block_until_ready(out)

        a_ref = a_pad[:num_nodes, :num_nodes].astype(jnp.float32)
        ref = gcn_forward_ref(a_ref, x, w1, b1, w2, b2, wf, bf)

        assert out.shape == (num_nodes, 1)
        assert bool(jnp.all(jnp.isfinite(out)))
        assert bool(jnp.all((out >= 0.0) & (out <= 1.0)))
        err = float(jnp.max(jnp.abs(out - ref)))
        assert err < 5e-2, f"max abs err {err}"  # bf16-tolerant check

    key = jax.random.PRNGKey(0)
    k1, k2 = jax.random.split(key)
    # Fused path (A VMEM-resident, single pallas_call) — the toy / demo case.
    run_case(k1, num_nodes=256, num_features=16, hidden=32, num_edges=1024,
             force_tiled=False)
    # Tiled fallback path (exercises the multi-tile grid + accumulator loop).
    run_case(k2, num_nodes=600, num_features=16, hidden=32, num_edges=2048,
             force_tiled=True, max_k_tile=256)
    print("KERNEL_OK")
</pallas_src>

<mosaic_0001>
module attributes {stable_mosaic.version = 11 : i64} {
  func.func @_gcn_fused_kernel(%arg0: i32, %arg1: i32, %arg2: memref<256x256xbf16, #tpu.memory_space<any>>, %arg3: memref<256x32xbf16, #tpu.memory_space<vmem>>, %arg4: memref<1x32xf32, #tpu.memory_space<vmem>>, %arg5: memref<32x32xbf16, #tpu.memory_space<vmem>>, %arg6: memref<1x32xf32, #tpu.memory_space<vmem>>, %arg7: memref<1x32xf32, #tpu.memory_space<vmem>>, %arg8: memref<1x1xf32, #tpu.memory_space<smem>>, %arg9: memref<1x256x1xf32, #tpu.memory_space<vmem>>, %arg10: memref<256x256xbf16, #tpu.memory_space<vmem>>, %arg11: memref<256x32xbf16, #tpu.memory_space<vmem>>, %arg12: memref<!tpu.dma_semaphore, #tpu.memory_space<semaphore_mem>>) attributes {dimension_semantics = [#tpu.dimension_semantics<arbitrary>, #tpu.dimension_semantics<arbitrary>], iteration_bounds = array<i64: 2, 1>, scalar_prefetch = 0 : i64, scratch_operands = 3 : i64, tpu.core_type = #tpu.core_type<tc>, window_params = [{}, {pipeline_mode = #tpu.pipeline_mode<synchronous>, transform_indices = @transform_1, window_bounds = array<i64: 256, 32>}, {pipeline_mode = #tpu.pipeline_mode<synchronous>, transform_indices = @transform_2, window_bounds = array<i64: 1, 32>}, {pipeline_mode = #tpu.pipeline_mode<synchronous>, transform_indices = @transform_3, window_bounds = array<i64: 32, 32>}, {pipeline_mode = #tpu.pipeline_mode<synchronous>, transform_indices = @transform_4, window_bounds = array<i64: 1, 32>}, {pipeline_mode = #tpu.pipeline_mode<synchronous>, transform_indices = @transform_5, window_bounds = array<i64: 1, 32>}, {transform_indices = @transform_6, window_bounds = array<i64: 1, 1>}, {transform_indices = @transform_7, window_bounds = array<i64: 1, 256, 1>}]} {
    %c256_i32 = arith.constant 256 : i32
    %0 = arith.muli %arg1, %c256_i32 : i32
    %1 = tpu.assume_multiple %0, 256 : i32
    %c0_i32 = arith.constant 0 : i32
    %2 = arith.cmpi eq, %arg0, %c0_i32 : i32
    %c0_i32_0 = arith.constant 0 : i32
    %3 = arith.cmpi eq, %arg1, %c0_i32_0 : i32
    %4 = arith.andi %2, %3 : i1
    %5 = arith.extui %4 : i1 to i32
    %c0_i32_1 = arith.constant 0 : i32
    %6 = arith.cmpi ne, %5, %c0_i32_1 : i32
    scf.if %6 {
      tpu.enqueue_dma source(%arg2 : memref<256x256xbf16, #tpu.memory_space<any>>) target(%arg10 : memref<256x256xbf16, #tpu.memory_space<vmem>>) target_semaphore(%arg12 : memref<!tpu.dma_semaphore, #tpu.memory_space<semaphore_mem>>)
      tpu.wait_dma2 semaphore(%arg12 : memref<!tpu.dma_semaphore, #tpu.memory_space<semaphore_mem>>) src(%arg2 : memref<256x256xbf16, #tpu.memory_space<any>>) dst(%arg10 : memref<256x256xbf16, #tpu.memory_space<vmem>>)
    } else {
    }
    %c0_i32_2 = arith.constant 0 : i32
    %7 = arith.cmpi eq, %arg0, %c0_i32_2 : i32
    %8 = arith.extui %7 : i1 to i32
    %c0_i32_3 = arith.constant 0 : i32
    %9 = arith.cmpi ne, %8, %c0_i32_3 : i32
    scf.if %9 {
      %13 = arith.index_cast %1 : i32 to index
      %c0 = arith.constant 0 : index
      %14 = vector.load %arg10[%13, %c0] : memref<256x256xbf16, #tpu.memory_space<vmem>>, vector<256x256xbf16>
      %c0_5 = arith.constant 0 : index
      %c0_6 = arith.constant 0 : index
      %15 = vector.load %arg3[%c0_5, %c0_6] : memref<256x32xbf16, #tpu.memory_space<vmem>>, vector<256x32xbf16>
      %cst = arith.constant dense<0.000000e+00> : vector<256x32xf32>
      %16 = tpu.matmul %14, %15, %cst {dimension_numbers = #tpu.dot_dimension_numbers<[1], [0], [0], [1], [0, 0, 1, 1], [], []>} : vector<256x256xbf16>, vector<256x32xbf16>, vector<256x32xf32> -> vector<256x32xf32>
      %c0_7 = arith.constant 0 : index
      %c0_8 = arith.constant 0 : index
      %17 = vector.load %arg4[%c0_7, %c0_8] : memref<1x32xf32, #tpu.memory_space<vmem>>, vector<1x32xf32>
      %18 = vector.broadcast %17 : vector<1x32xf32> to vector<256x32xf32>
      %19 = arith.addf %16, %18 : vector<256x32xf32>
      %cst_9 = arith.constant 0.000000e+00 : f32
      %20 = vector.broadcast %cst_9 : f32 to vector<256x32xf32>
      %21 = arith.cmpf ogt, %19, %20 : vector<256x32xf32>
      %cst_10 = arith.constant 2.000000e-01 : f32
      %22 = vector.broadcast %cst_10 : f32 to vector<256x32xf32>
      %23 = arith.mulf %22, %19 : vector<256x32xf32>
      %24 = arith.select %21, %19, %23 : vector<256x32xi1>, vector<256x32xf32>
      %25 = arith.truncf %24 : vector<256x32xf32> to vector<256x32xbf16>
      %c0_11 = arith.constant 0 : index
      %c0_12 = arith.constant 0 : index
      %26 = vector.load %arg5[%c0_11, %c0_12] : memref<32x32xbf16, #tpu.memory_space<vmem>>, vector<32x32xbf16>
      %cst_13 = arith.constant dense<0.000000e+00> : vector<256x32xf32>
      %27 = tpu.matmul %25, %26, %cst_13 {dimension_numbers = #tpu.dot_dimension_numbers<[1], [0], [0], [1], [0, 0, 1, 1], [], []>} : vector<256x32xbf16>, vector<32x32xbf16>, vector<256x32xf32> -> vector<256x32xf32>
      %28 = arith.truncf %27 : vector<256x32xf32> to vector<256x32xbf16>
      %29 = arith.index_cast %1 : i32 to index
      %c0_14 = arith.constant 0 : index
      %30 = vector.load %arg11[%29, %c0_14] : memref<256x32xbf16, #tpu.memory_space<vmem>>, vector<256x32xbf16>
      tpu.vector_store %arg11[%29, %c0_14], %28 {strides = array<i32>} : memref<256x32xbf16, #tpu.memory_space<vmem>>, vector<256x32xbf16>,
      %cst_15 = arith.constant 0.000000e+00 : f32
      %31 = vector.broadcast %cst_15 : f32 to vector<1x256x1xf32>
      %c0_16 = arith.constant 0 : index
      %c0_17 = arith.constant 0 : index
      %c0_18 = arith.constant 0 : index
      %32 = vector.load %arg9[%c0_16, %c0_17, %c0_18] : memref<1x256x1xf32, #tpu.memory_space<vmem>>, vector<1x256x1xf32>
      tpu.vector_store %arg9[%c0_16, %c0_17, %c0_18], %31 {strides = array<i32>} : memref<1x256x1xf32, #tpu.memory_space<vmem>>, vector<1x256x1xf32>,
    } else {
    }
    %c1_i32 = arith.constant 1 : i32
    %10 = arith.cmpi eq, %arg0, %c1_i32 : i32
    %11 = arith.extui %10 : i1 to i32
    %c0_i32_4 = arith.constant 0 : i32
    %12 = arith.cmpi ne, %11, %c0_i32_4 : i32
    scf.if %12 {
      %13 = arith.index_cast %1 : i32 to index
      %c0 = arith.constant 0 : index
      %14 = vector.load %arg10[%13, %c0] : memref<256x256xbf16, #tpu.memory_space<vmem>>, vector<256x256xbf16>
      %c0_5 = arith.constant 0 : index
      %c0_6 = arith.constant 0 : index
      %15 = vector.load %arg11[%c0_5, %c0_6] : memref<256x32xbf16, #tpu.memory_space<vmem>>, vector<256x32xbf16>
      %cst = arith.constant dense<0.000000e+00> : vector<256x32xf32>
      %16 = tpu.matmul %14, %15, %cst {dimension_numbers = #tpu.dot_dimension_numbers<[1], [0], [0], [1], [0, 0, 1, 1], [], []>} : vector<256x256xbf16>, vector<256x32xbf16>, vector<256x32xf32> -> vector<256x32xf32>
      %c0_7 = arith.constant 0 : index
      %c0_8 = arith.constant 0 : index
      %17 = vector.load %arg6[%c0_7, %c0_8] : memref<1x32xf32, #tpu.memory_space<vmem>>, vector<1x32xf32>
      %18 = vector.broadcast %17 : vector<1x32xf32> to vector<256x32xf32>
      %19 = arith.addf %16, %18 : vector<256x32xf32>
      %cst_9 = arith.constant 0.000000e+00 : f32
      %20 = vector.broadcast %cst_9 : f32 to vector<256x32xf32>
      %21 = arith.cmpf ogt, %19, %20 : vector<256x32xf32>
      %cst_10 = arith.constant 2.000000e-01 : f32
      %22 = vector.broadcast %cst_10 : f32 to vector<256x32xf32>
      %23 = arith.mulf %22, %19 : vector<256x32xf32>
      %24 = arith.select %21, %19, %23 : vector<256x32xi1>, vector<256x32xf32>
      %c0_11 = arith.constant 0 : index
      %c0_12 = arith.constant 0 : index
      %25 = vector.load %arg7[%c0_11, %c0_12] : memref<1x32xf32, #tpu.memory_space<vmem>>, vector<1x32xf32>
      %26 = vector.broadcast %25 : vector<1x32xf32> to vector<256x32xf32>
      %27 = arith.mulf %24, %26 : vector<256x32xf32>
      %cst_13 = arith.constant dense<0.000000e+00> : vector<256xf32>
      %28 = vector.multi_reduction <add>, %27, %cst_13 [1] : vector<256x32xf32> to vector<256xf32>
      %29 = vector.shape_cast %28 : vector<256xf32> to vector<256x1xf32>
      %c0_14 = arith.constant 0 : index
      %c0_15 = arith.constant 0 : index
      %30 = memref.load %arg8[%c0_14, %c0_15] : memref<1x1xf32, #tpu.memory_space<smem>>
      %31 = vector.broadcast %30 : f32 to vector<256x1xf32>
      %32 = arith.addf %29, %31 : vector<256x1xf32>
      %33 = arith.negf %32 : vector<256x1xf32>
      %34 = math.exp %33 : vector<256x1xf32>
      %cst_16 = arith.constant 1.000000e+00 : f32
      %35 = vector.broadcast %cst_16 : f32 to vector<256x1xf32>
      %36 = arith.addf %35, %34 : vector<256x1xf32>
      %37 = arith.divf %35, %36 : vector<256x1xf32>
      %38 = vector.shape_cast %37 : vector<256x1xf32> to vector<1x256x1xf32>
      %c0_17 = arith.constant 0 : index
      %c0_18 = arith.constant 0 : index
      %c0_19 = arith.constant 0 : index
      %39 = vector.load %arg9[%c0_17, %c0_18, %c0_19] : memref<1x256x1xf32, #tpu.memory_space<vmem>>, vector<1x256x1xf32>
      tpu.vector_store %arg9[%c0_17, %c0_18, %c0_19], %38 {strides = array<i32>} : memref<1x256x1xf32, #tpu.memory_space<vmem>>, vector<1x256x1xf32>,
    } else {
    }
    return
  }
  func.func @transform_1(%arg0: i32, %arg1: i32) -> (i32, i32) {
    %c0_i32 = arith.constant 0 : i32
    %c0_i32_0 = arith.constant 0 : i32
    %c0_i32_1 = arith.constant 0 : i32
    return %c0_i32, %c0_i32_0 : i32, i32
  }
  func.func @transform_2(%arg0: i32, %arg1: i32) -> (i32, i32) {
    %c0_i32 = arith.constant 0 : i32
    %c0_i32_0 = arith.constant 0 : i32
    %c0_i32_1 = arith.constant 0 : i32
    return %c0_i32, %c0_i32_0 : i32, i32
  }
  func.func @transform_3(%arg0: i32, %arg1: i32) -> (i32, i32) {
    %c0_i32 = arith.constant 0 : i32
    %c0_i32_0 = arith.constant 0 : i32
    %c0_i32_1 = arith.constant 0 : i32
    return %c0_i32, %c0_i32_0 : i32, i32
  }
  func.func @transform_4(%arg0: i32, %arg1: i32) -> (i32, i32) {
    %c0_i32 = arith.constant 0 : i32
    %c0_i32_0 = arith.constant 0 : i32
    %c0_i32_1 = arith.constant 0 : i32
    return %c0_i32, %c0_i32_0 : i32, i32
  }
  func.func @transform_5(%arg0: i32, %arg1: i32) -> (i32, i32) {
    %c0_i32 = arith.constant 0 : i32
    %c0_i32_0 = arith.constant 0 : i32
    %c0_i32_1 = arith.constant 0 : i32
    return %c0_i32, %c0_i32_0 : i32, i32
  }
  func.func @transform_6(%arg0: i32, %arg1: i32) -> (i32, i32) {
    %c0_i32 = arith.constant 0 : i32
    %c0_i32_0 = arith.constant 0 : i32
    %c0_i32_1 = arith.constant 0 : i32
    return %c0_i32, %c0_i32_0 : i32, i32
  }
  func.func @transform_7(%arg0: i32, %arg1: i32) -> (i32, i32, i32) {
    %c0_i32 = arith.constant 0 : i32
    %c0_i32_0 = arith.constant 0 : i32
    return %arg0, %arg1, %c0_i32 : i32, i32, i32
  }
}

</mosaic_0001>

<bundles_post_ra>
// kernel: tpu_custom_call.1
= control target key start
LH: loop header
LB: loop body
LE: loop exit
PB: predicated region body
PF: predicated region fallthrough
CT: control target
= control target key end

     0   :  { %s2508_s26 = smov 0   ;;  %s2510_s27 = smov 0   ;;  %s3004_s0 = inlined_call_operand.hbm [shape: bf16[256,256], index: 0, kind: input, shape index: {}]   ;;  %s3005_s1 = inlined_call_operand.vmem [shape: bf16[256,32], index: 1, kind: input, shape index: {}]   ;;  %s3006_s2 = inlined_call_operand.vmem [shape: f32[1,32], index: 2, kind: input, shape index: {}]   ;;  %s3007_s3 = inlined_call_operand.vmem [shape: bf16[32,32], index: 3, kind: input, shape index: {}]   ;;  %s3008_s4 = inlined_call_operand.vmem [shape: f32[1,32], index: 4, kind: input, shape index: {}]   ;;  %s3009_s5 = inlined_call_operand.vmem [shape: f32[1,32], index: 5, kind: input, shape index: {}]   ;;  %s3010_s6 = inlined_call_operand.<no memory space> [shape: f32[1,1], index: 6, kind: input, shape index: {}]   ;;  %s3011_s7 = inlined_call_operand.vmem [shape: f32[2,256,1], index: 7, kind: output, shape index: {}]  }
   0x1   :  { %12 = sst [smem:[#allocation5]] %s3010_s6  ;;  %s2512_s28 = smov 0  }
   0x2 LB: > { %s30_s6 = sadd.s32 1, %s2450_s27  ;;  %p1845_p0 = scmp.ge.s32.totalorder %s2454_s28, 1  ;;  %s2454_s28 = sphi %s2512_s28, %s18_s28   ;;  %s2450_s27 = sphi %s2510_s27, %s3013_s27   ;;  %s2446_s26 = sphi %s2508_s26, %s3012_s26  }
   0x3   : > { %p32_p1 = scmp.ge.s32.totalorder %s30_s6, 2  ;;  %p218_p2 = scmp.lt.s32.totalorder %s2454_s28, 3 }
   0x5   : > { %s3015_s6 = smov (%p32_p1, %s30_s6), 0  ;;  %p219_p3 = pnand %p1845_p0, %p218_p2 }
   0x6   : > { %p248_p4 = scmp.lt.s32.totalorder (!%p219_p3), %s2446_s26, 1  ;;  %p259_p5 = scmp.eq.s32.totalorder (!%p219_p3), %s2446_s26, 0 }
   0x7   : > { %222 = sbr.rel (%p219_p3) target bundleno = 1106 (0x452), region = 44 }
   0xe   : > { %s249_s29 = scalar_select %p248_p4, %s2446_s26, 1 }
  0x10   : > { %s1925_s30 = sshll.u32 %s249_s29, 8 }
  0x11   : > { %s2534_s10 = scalar_lea.vmem %s3011_s7, %s1925_s30 }
  0x12   : > { %s2237_s11 = scalar_select %p259_p5, [#allocation0], [#allocation8] }
  0x13   : > { %s2456_s13 = smov [#allocation2]   ;;  %s2457_s15 = smov 256  }
  0x14   : > { %s269_s12 = sld [smem:[%s2237_s11]]   ;;  %s277_s14 = sshll.u32 %s2456_s13, 4  ;;  %s278_s14 = int_to_ptr.vmem [resolvable:$true] %s277_s14 }
  0x15   : > { %2238 = sst [smem:[#allocation7]] (%p259_p5), %s2457_s15  ;;  %s2458_s16 = smov 2  }
  0x16   : > { %2239 = sst [smem:[#allocation7 + $0x1]] (%p259_p5), %s2457_s15  ;;  %s2459_s17 = smov 64  }
  0x17   : > { %2240 = sst [smem:[#allocation7 + $0x2]] (%p259_p5), %s2458_s16  ;;  %s2460_s18 = smov 128  }
  0x18   : > { %2241 = sst [smem:[#allocation7 + $0x3]] (%p259_p5), %s2459_s17  ;;  %s2461_s21 = smov 4  }
  0x19   : > { %2242 = sst [smem:[#allocation7 + $0x4]] (%p259_p5), %s2460_s18  ;;  %s2462_s22 = smov [#allocation4]  }
  0x1a   : > { %s1849_s19 = sshll.u32 %s269_s12, 26  ;;  %2243 = sst [smem:[#allocation7 + $0x5]] (%p259_p5), %s2458_s16 }
  0x1b   : > { %s1850_s20 = sadd.s32 134217728, %s1849_s19  ;;  %2244 = sst [smem:[#allocation7 + $0x6]] (%p259_p5), %s2460_s18 }
  0x1c   : > { %2245 = sst [smem:[#allocation7 + $0x7]] (%p259_p5), %s2459_s17  ;;  %s2463_s23 = smov [#allocation6]  }
  0x1d   : > { %2246 = sst [smem:[#allocation7 + $0x8]] (%p259_p5), %s2461_s21 }
  0x1e   : > { %2247 = dma.general (%p259_p5), %s3004_s0, 4096, %s278_s14, %s2462_s22, %s2463_s23, [#allocation7], %s1850_s20, 0  }
  0x1f   : > { %2441 = dma.done.wait (%p259_p5), [#allocation4], 4096 }
  0x20   : > { %2443 = vsyncadd (%p259_p5), [#allocation4], 4294963200  ;;  %p1851_p6 = scmp.ne.s32.totalorder %s2446_s26, 0 }
  0x21   : > { %v2282_v0 = vld [vmem:[%s3005_s1 + $0x40] sm:$0xff] (!%p1851_p6)   ;;  %v2284_v2 = vld [vmem:[%s3005_s1 + $0x48] sm:$0xff] (!%p1851_p6)   ;;  %v2286_v4 = vld [vmem:[%s3005_s1 + $0x50] sm:$0xff] (!%p1851_p6)   ;;  %vm768_vm3 = vcmask (!%p1851_p6), 261120  }
  0x22   : > { %306 = sbr.rel (%p1851_p6) target bundleno = 612 (0x264), region = 52  ;;  %v2283_v1 = vld [vmem:[%s3005_s1] sm:$0xff] (!%p1851_p6)   ;;  %1927 = vmatprep.subr.bf16.mxu0 (!%p1851_p6), %v2282_v0  ;;  %2205 = vmatprep.subr.bf16.mxu1 (!%p1851_p6), %v2282_v0  ;;  %v2285_v3 = vld [vmem:[%s3005_s1 + $0x8] sm:$0xff] (!%p1851_p6)   ;;  %v2287_v5 = vld [vmem:[%s3005_s1 + $0x10] sm:$0xff] (!%p1851_p6)  }
  0x23   : > { %1928 = vmatpush3.bf16.msra.mxu0 (!%p1851_p6), %v2283_v1  ;;  %2213 = vmatpush3.bf16.msra.mxu1 (!%p1851_p6), %v2283_v1  ;;  %v2288_v6 = vld [vmem:[%s3005_s1 + $0x58] sm:$0xff] (!%p1851_p6)   ;;  %v2290_v8 = vld [vmem:[%s3005_s1 + $0x60] sm:$0xff] (!%p1851_p6)   ;;  %v2292_v10 = vld [vmem:[%s3005_s1 + $0x68] sm:$0xff] (!%p1851_p6)  }
  0x24   : > { %1929 = vmatprep.subr.bf16.mxu0 (!%p1851_p6), %v2284_v2  ;;  %2206 = vmatprep.subr.bf16.mxu1 (!%p1851_p6), %v2284_v2  ;;  %v2289_v7 = vld [vmem:[%s3005_s1 + $0x18] sm:$0xff] (!%p1851_p6)   ;;  %v2291_v9 = vld [vmem:[%s3005_s1 + $0x20] sm:$0xff] (!%p1851_p6)   ;;  %v313_v11 = vld [vmem:[#allocation2 + $0x8] sm:$0xff] (!%p1851_p6) }
  0x25   : > { %511 = vmatprep.mubr.bf16.mxu0 (!%p1851_p6), %v313_v11  ;;  %v2293_v12 = vld [vmem:[%s3005_s1 + $0x28] sm:$0xff] (!%p1851_p6)   ;;  %v2294_v13 = vld [vmem:[%s3005_s1 + $0x70] sm:$0xff] (!%p1851_p6)   ;;  %v2296_v16 = vld [vmem:[%s3005_s1 + $0x78] sm:$0xff] (!%p1851_p6)  }
  0x26   : > { %v337_v14 = vld [vmem:[#allocation2 + $0xc8] sm:$0xff] (!%p1851_p6)  ;;  %v2295_v15 = vld [vmem:[%s3005_s1 + $0x30] sm:$0xff] (!%p1851_p6)   ;;  %v2297_v17 = vld [vmem:[%s3005_s1 + $0x38] sm:$0xff] (!%p1851_p6)  }
  0x27   : > { %1930 = vmatpush3.bf16.msra.mxu0 (!%p1851_p6), %v2285_v3  ;;  %2214 = vmatpush3.bf16.msra.mxu1 (!%p1851_p6), %v2285_v3  ;;  %v312_v18 = vld [vmem:[#allocation2] sm:$0xff] (!%p1851_p6)  ;;  %v315_v20 = vld [vmem:[#allocation2 + $0x18] sm:$0xff] (!%p1851_p6)  ;;  %v314_v22 = vld [vmem:[#allocation2 + $0x10] sm:$0xff] (!%p1851_p6) }
  0x28   : > { %1931 = vmatprep.subr.bf16.mxu0 (!%p1851_p6), %v2286_v4  ;;  %2207 = vmatprep.subr.bf16.mxu1 (!%p1851_p6), %v2286_v4  ;;  %v336_v19 = vld [vmem:[#allocation2 + $0xc0] sm:$0xff] (!%p1851_p6)  ;;  %v339_v21 = vld [vmem:[#allocation2 + $0xd8] sm:$0xff] (!%p1851_p6)  ;;  %v338_v23 = vld [vmem:[#allocation2 + $0xd0] sm:$0xff] (!%p1851_p6) }
  0x29   : > { %607 = vmatprep.mubr.bf16.mxu1 %v337_v14  ;;  %v317_v24 = vld [vmem:[#allocation2 + $0x28] sm:$0xff]  ;;  %v316_v26 = vld [vmem:[#allocation2 + $0x20] sm:$0xff]  ;;  %v319_v28 = vld [vmem:[#allocation2 + $0x38] sm:$0xff] }
  0x2a   : > { %v341_v25 = vld [vmem:[#allocation2 + $0xe8] sm:$0xff]  ;;  %v340_v27 = vld [vmem:[#allocation2 + $0xe0] sm:$0xff]  ;;  %v343_v29 = vld [vmem:[#allocation2 + $0xf8] sm:$0xff] }
  0x2b   : > { %1932 = vmatpush3.bf16.msra.mxu0 %v2287_v5  ;;  %2215 = vmatpush3.bf16.msra.mxu1 %v2287_v5  ;;  %v318_v30 = vld [vmem:[#allocation2 + $0x30] sm:$0xff]  ;;  %v321_v32 = vld [vmem:[#allocation2 + $0x48] sm:$0xff]  ;;  %v320_v33 = vld [vmem:[#allocation2 + $0x40] sm:$0xff] }
  0x2c   : > { %1933 = vmatprep.subr.bf16.mxu0 %v2288_v6  ;;  %2208 = vmatprep.subr.bf16.mxu1 %v2288_v6  ;;  %v342_v31 = vld [vmem:[#allocation2 + $0xf0] sm:$0xff]  ;;  %v323_v34 = vld [vmem:[#allocation2 + $0x58] sm:$0xff]  ;;  %v325_v36 = vld [vmem:[#allocation2 + $0x68] sm:$0xff] }
  0x2d   : > { %v322_v35 = vld [vmem:[#allocation2 + $0x50] sm:$0xff]  ;;  %v324_v37 = vld [vmem:[#allocation2 + $0x60] sm:$0xff]  ;;  %v327_v38 = vld [vmem:[#allocation2 + $0x78] sm:$0xff] }
  0x2e   : > { %v326_v39 = vld [vmem:[#allocation2 + $0x70] sm:$0xff]  ;;  %v329_v40 = vld [vmem:[#allocation2 + $0x88] sm:$0xff]  ;;  %v328_v41 = vld [vmem:[#allocation2 + $0x80] sm:$0xff] }
  0x2f   : > { %1934 = vmatpush3.bf16.msra.mxu0 %v2289_v7  ;;  %2216 = vmatpush3.bf16.msra.mxu1 %v2289_v7  ;;  %v331_v42 = vld [vmem:[#allocation2 + $0x98] sm:$0xff]  ;;  %v330_v43 = vld [vmem:[#allocation2 + $0x90] sm:$0xff]  ;;  %v333_v44 = vld [vmem:[#allocation2 + $0xa8] sm:$0xff] }
  0x30   : > { %1935 = vmatprep.subr.bf16.mxu0 %v2290_v8  ;;  %2209 = vmatprep.subr.bf16.mxu1 %v2290_v8  ;;  %v332_v45 = vld [vmem:[#allocation2 + $0xa0] sm:$0xff]  ;;  %v335_v46 = vld [vmem:[#allocation2 + $0xb8] sm:$0xff]  ;;  %v334_v47 = vld [vmem:[#allocation2 + $0xb0] sm:$0xff] }
  0x31   : > { %v2298_v48 = vld [vmem:[%s3007_s3] sm:$0xff]   ;;  %v2299_v49 = vld [vmem:[%s3007_s3 + $0x8] sm:$0xff]  }
  0x32   : > { %v2623_v52 = vld [vmem:[%s3006_s2] ss:$0 sm:$0xff] }
  0x33   : > { %1936 = vmatpush3.bf16.msra.mxu0 %v2291_v9  ;;  %2217 = vmatpush3.bf16.msra.mxu1 %v2291_v9 }
  0x34   : > { %1937 = vmatprep.subr.bf16.mxu0 %v2292_v10  ;;  %2210 = vmatprep.subr.bf16.mxu1 %v2292_v10 }
  0x37   : > { %1938 = vmatpush3.bf16.msra.mxu0 %v2293_v12  ;;  %2218 = vmatpush3.bf16.msra.mxu1 %v2293_v12 }
  0x38   : > { %1939 = vmatprep.subr.bf16.mxu0 %v2294_v13  ;;  %2211 = vmatprep.subr.bf16.mxu1 %v2294_v13 }
  0x3b   : > { %1940 = vmatpush3.bf16.msra.mxu0 %v2295_v15  ;;  %2219 = vmatpush3.bf16.msra.mxu1 %v2295_v15 }
  0x3c   : > { %1941 = vmatprep.subr.bf16.mxu0 %v2296_v16  ;;  %2212 = vmatprep.subr.bf16.mxu1 %v2296_v16 }
  0x3f   : > { %1942 = vmatpush3.bf16.msra.mxu0 %v2297_v17  ;;  %2220 = vmatpush3.bf16.msra.mxu1 %v2297_v17 }
  0x40   : > { %2169 = vmatprep.subr.bf16.mxu1 %v2298_v48 }
  0x42   : > { %512 = vmatmul.mubr.bf16.vlgmr.msra.gmra.mrb[0].mxu0 %v312_v18  ;;  %608 = vmatmul.mubr.bf16.vlgmr.msra.gmra.mrb[0].mxu1 %v336_v19 }
  0x43   : > { %519 = vmatprep.mubr.bf16.mxu0 %v315_v20  ;;  %615 = vmatprep.mubr.bf16.mxu1 %v339_v21 }
  0x44   : > { %2170 = vmatpush3.bf16.msra.mxu1 %v2298_v48 }
  0x45   : > { %2171 = vmatprep.subr.bf16.mxu1 %v2299_v49 }
  0x48   : > { %2172 = vmatpush3.bf16.msra.mxu1 %v2299_v49 }
  0x4a   : > { %520 = vmatmul.mubr.bf16.gmra.mrb[4].mxu0 %v314_v22  ;;  %616 = vmatmul.mubr.bf16.gmra.mrb[4].mxu1 %v338_v23 }
  0x4b   : > { %527 = vmatprep.mubr.bf16.mxu0 %v317_v24  ;;  %623 = vmatprep.mubr.bf16.mxu1 %v341_v25 }
  0x52   : > { %528 = vmatmul.mubr.bf16.gmra.mrb[8].mxu0 %v316_v26  ;;  %624 = vmatmul.mubr.bf16.gmra.mrb[8].mxu1 %v340_v27 }
  0x53   : > { %535 = vmatprep.mubr.bf16.mxu0 %v319_v28  ;;  %631 = vmatprep.mubr.bf16.mxu1 %v343_v29 }
  0x5a   : > { %536 = vmatmul.mubr.bf16.gmra.mrb[12].mxu0 %v318_v30  ;;  %632 = vmatmul.mubr.bf16.gmra.mrb[12].mxu1 %v342_v31 }
  0x5b   : > { %543 = vmatprep.mubr.bf16.mxu0 %v321_v32 }
  0x62   : > { %544 = vmatmul.mubr.bf16.gmra.mrb[16].mxu0 %v320_v33 }
  0x63   : > { %551 = vmatprep.mubr.bf16.mxu0 %v323_v34 }
  0x6a   : > { %552 = vmatmul.mubr.bf16.gmra.mrb[20].mxu0 %v322_v35 }
  0x6b   : > { %559 = vmatprep.mubr.bf16.mxu0 %v325_v36 }
  0x72   : > { %560 = vmatmul.mubr.bf16.gmra.mrb[24].mxu0 %v324_v37 }
  0x73   : > { %567 = vmatprep.mubr.bf16.mxu0 %v327_v38 }
  0x7a   : > { %568 = vmatmul.mubr.bf16.gmra.mrb[28].mxu0 %v326_v39 }
  0x7b   : > { %575 = vmatprep.mubr.bf16.mxu0 %v329_v40 }
  0x82   : > { %576 = vmatmul.mubr.bf16.gmra.mrb[32].mxu0 %v328_v41 }
  0x83   : > { %583 = vmatprep.mubr.bf16.mxu0 %v331_v42 }
  0x8a   : > { %584 = vmatmul.mubr.bf16.gmra.mrb[36].mxu0 %v330_v43 }
  0x8b   : > { %591 = vmatprep.mubr.bf16.mxu0 %v333_v44 }
  0x92   : > { %592 = vmatmul.mubr.bf16.gmra.mrb[40].mxu0 %v332_v45 }
  0x93   : > { %599 = vmatprep.mubr.bf16.mxu0 %v335_v46 }
  0x9a   : > { %600 = vmatmul.mubr.bf16.gmra.mrb[44].mxu0 %v334_v47 }
 0x115   : > { %v1943_v50 = vpop.f32.mrb[0].mxu0  ;;  %v2015_v51 = vpop.f32.mrb[0].mxu1 }
 0x116   : > { %v1944_v53 = vpop.f32.mrb[1].mxu0  ;;  %v2016_v54 = vpop.f32.mrb[1].mxu1 }
 0x117   : > { %v1945_v55 = vadd.f32 %v1944_v53, %v1943_v50  ;;  %v1946_v56 = vpop.f32.mrb[2].mxu0  ;;  %v2017_v57 = vadd.f32 %v2016_v54, %v2015_v51  ;;  %v2018_v58 = vpop.f32.mrb[2].mxu1 }
 0x118   : > { %v1947_v59 = vpop.f32.mrb[3].mxu0  ;;  %v2019_v60 = vpop.f32.mrb[3].mxu1 }
 0x119   : > { %v514_v61 = vadd.f32 %v1945_v55, %v2623_v52  ;;  %v1948_v62 = vadd.f32 %v1947_v59, %v1946_v56  ;;  %v610_v63 = vadd.f32 %v2017_v57, %v2623_v52  ;;  %v2020_v0 = vadd.f32 %v2019_v60, %v2018_v58 }
 0x11b   : > { %vm640_vm0 = vcmp.gt.f32.partialorder %v514_v61, 0.0  ;;  %v672_v1 = vmul.f32 0.2, %v514_v61  ;;  %v517_v2 = vadd.f32 %v1948_v62, %v2623_v52  ;;  %vm664_vm1 = vcmp.gt.f32.partialorder %v610_v63, 0.0 }
 0x11c   : > { %v696_v3 = vmul.f32 0.2, %v610_v63  ;;  %v613_v4 = vadd.f32 %v2020_v0, %v2623_v52 }
 0x11d   : > { %vm641_vm2 = vcmp.gt.f32.partialorder %v517_v2, 0.0  ;;  %v673_v5 = vmul.f32 0.2, %v517_v2  ;;  %v1949_v6 = vpop.f32.mrb[4].mxu0  ;;  %v2021_v7 = vpop.f32.mrb[4].mxu1  ;;  %v704_v8 = vsel %vm640_vm0, %v514_v61, %v672_v1 }
 0x11e   : > { %v1950_v9 = vpop.f32.mrb[5].mxu0  ;;  %vm665_vm4 = vcmp.gt.f32.partialorder %v613_v4, 0.0  ;;  %v697_v10 = vmul.f32 0.2, %v613_v4  ;;  %v2022_v11 = vpop.f32.mrb[5].mxu1  ;;  %v2630_v15 = vsel %vm664_vm1, %v610_v63, %v696_v3 }
 0x11f   : > { %v705_v12 = vsel %vm641_vm2, %v517_v2, %v673_v5  ;;  %v1951_v13 = vadd.f32 %v1950_v9, %v1949_v6  ;;  %v1952_v14 = vpop.f32.mrb[6].mxu0  ;;  %v2023_v16 = vadd.f32 %v2022_v11, %v2021_v7  ;;  %v2024_v17 = vpop.f32.mrb[6].mxu1 }
 0x120   : > { %v1953_v18 = vpop.f32.mrb[7].mxu0  ;;  %v736_v19 = vpack.c.bf16 %v705_v12, %v704_v8  ;;  %v2632_v20 = vsel %vm665_vm4, %v613_v4, %v697_v10  ;;  %v2025_v21 = vpop.f32.mrb[7].mxu1 }
 0x121   : > { %v522_v22 = vadd.f32 %v1951_v13, %v2623_v52  ;;  %v1954_v23 = vadd.f32 %v1953_v18, %v1952_v14  ;;  %v618_v24 = vadd.f32 %v2023_v16, %v2623_v52  ;;  %v2026_v25 = vadd.f32 %v2025_v21, %v2024_v17 }
 0x122   : > { %2173 = vmatprep.mubr.msk.bf16.mxu1 %vm768_vm3, %v736_v19  ;;  %v748_v26 = vpack.c.bf16 %v2632_v20, %v2630_v15 }
 0x123   : > { %vm642_vm5 = vcmp.gt.f32.partialorder %v522_v22, 0.0  ;;  %v674_v27 = vmul.f32 0.2, %v522_v22  ;;  %v525_v28 = vadd.f32 %v1954_v23, %v2623_v52  ;;  %vm666_vm6 = vcmp.gt.f32.partialorder %v618_v24, 0.0 }
 0x124   : > { %v698_v29 = vmul.f32 0.2, %v618_v24  ;;  %v621_v30 = vadd.f32 %v2026_v25, %v2623_v52 }
 0x125   : > { %vm643_vm7 = vcmp.gt.f32.partialorder %v525_v28, 0.0  ;;  %v675_v31 = vmul.f32 0.2, %v525_v28  ;;  %v1955_v32 = vpop.f32.mrb[8].mxu0  ;;  %v2027_v33 = vpop.f32.mrb[8].mxu1  ;;  %v706_v34 = vsel %vm642_vm5, %v522_v22, %v674_v27 }
 0x126   : > { %v1956_v35 = vpop.f32.mrb[9].mxu0  ;;  %vm667_vm8 = vcmp.gt.f32.partialorder %v621_v30, 0.0  ;;  %v699_v36 = vmul.f32 0.2, %v621_v30  ;;  %v2028_v37 = vpop.f32.mrb[9].mxu1  ;;  %v2641_v41 = vsel %vm666_vm6, %v618_v24, %v698_v29 }
 0x127   : > { %v707_v38 = vsel %vm643_vm7, %v525_v28, %v675_v31  ;;  %v1957_v39 = vadd.f32 %v1956_v35, %v1955_v32  ;;  %v1958_v40 = vpop.f32.mrb[10].mxu0  ;;  %v2029_v42 = vadd.f32 %v2028_v37, %v2027_v33  ;;  %v2030_v43 = vpop.f32.mrb[10].mxu1 }
 0x128   : > { %v737_v44 = vpack.c.bf16 %v707_v38, %v706_v34  ;;  %v1959_v45 = vpop.f32.mrb[11].mxu0  ;;  %v2643_v46 = vsel %vm667_vm8, %v621_v30, %v699_v36  ;;  %v2031_v47 = vpop.f32.mrb[11].mxu1 }
 0x129   : > { %v530_v48 = vadd.f32 %v1957_v39, %v2623_v52  ;;  %v1960_v49 = vadd.f32 %v1959_v45, %v1958_v40  ;;  %v626_v50 = vadd.f32 %v2029_v42, %v2623_v52  ;;  %v2032_v51 = vadd.f32 %v2031_v47, %v2030_v43 }
 0x12a   : > { %2174 = vmatmul.mubr.msk.bf16.vlgmr.msra.gmra.mrb[16].mxu1 %vm768_vm3, %v737_v44  ;;  %v749_v53 = vpack.c.bf16 %v2643_v46, %v2641_v41 }
 0x12b   : > { %vm644_vm9 = vcmp.gt.f32.partialorder %v530_v48, 0.0  ;;  %v676_v54 = vmul.f32 0.2, %v530_v48  ;;  %v533_v55 = vadd.f32 %v1960_v49, %v2623_v52  ;;  %vm668_vm10 = vcmp.gt.f32.partialorder %v626_v50, 0.0 }
 0x12c   : > { %v700_v56 = vmul.f32 0.2, %v626_v50  ;;  %v629_v57 = vadd.f32 %v2032_v51, %v2623_v52 }
 0x12d   : > { %vm645_vm11 = vcmp.gt.f32.partialorder %v533_v55, 0.0  ;;  %v677_v58 = vmul.f32 0.2, %v533_v55  ;;  %v1961_v59 = vpop.f32.mrb[12].mxu0  ;;  %v2033_v60 = vpop.f32.mrb[12].mxu1  ;;  %v708_v61 = vsel %vm644_vm9, %v530_v48, %v676_v54 }
 0x12e   : > { %v1962_v62 = vpop.f32.mrb[13].mxu0  ;;  %vm669_vm12 = vcmp.gt.f32.partialorder %v629_v57, 0.0  ;;  %v701_v63 = vmul.f32 0.2, %v629_v57  ;;  %v2034_v0 = vpop.f32.mrb[13].mxu1  ;;  %v2652_v4 = vsel %vm668_vm10, %v626_v50, %v700_v56 }
 0x12f   : > { %v709_v1 = vsel %vm645_vm11, %v533_v55, %v677_v58  ;;  %v1963_v2 = vadd.f32 %v1962_v62, %v1961_v59  ;;  %v1964_v3 = vpop.f32.mrb[14].mxu0  ;;  %v2035_v5 = vadd.f32 %v2034_v0, %v2033_v60  ;;  %v2036_v6 = vpop.f32.mrb[14].mxu1 }
 0x130   : > { %v1965_v7 = vpop.f32.mrb[15].mxu0  ;;  %v738_v8 = vpack.c.bf16 %v709_v1, %v708_v61  ;;  %v2654_v9 = vsel %vm669_vm12, %v629_v57, %v701_v63  ;;  %v2037_v10 = vpop.f32.mrb[15].mxu1 }
 0x131   : > { %v538_v11 = vadd.f32 %v1963_v2, %v2623_v52  ;;  %v1966_v12 = vadd.f32 %v1965_v7, %v1964_v3  ;;  %v634_v13 = vadd.f32 %v2035_v5, %v2623_v52  ;;  %v2038_v14 = vadd.f32 %v2037_v10, %v2036_v6 }
 0x132   : > { %2177 = vmatprep.mubr.msk.bf16.mxu1 %vm768_vm3, %v738_v8  ;;  %v750_v16 = vpack.c.bf16 %v2654_v9, %v2652_v4 }
 0x133   : > { %v678_v17 = vmul.f32 0.2, %v538_v11  ;;  %v541_v18 = vadd.f32 %v1966_v12, %v2623_v52  ;;  %vm670_vm13 = vcmp.gt.f32.partialorder %v634_v13, 0.0  ;;  %vm646_vm14 = vcmp.gt.f32.partialorder %v538_v11, 0.0 }
 0x134   : > { %v702_v19 = vmul.f32 0.2, %v634_v13  ;;  %v637_v21 = vadd.f32 %v2038_v14, %v2623_v52 }
 0x135   : > { %vm647_vm15 = vcmp.gt.f32.partialorder %v541_v18, 0.0  ;;  %v679_v22 = vmul.f32 0.2, %v541_v18  ;;  %v1967_v23 = vpop.f32.mrb[16].mxu0  ;;  %v710_v28 = vsel %vm646_vm14, %v538_v11, %v678_v17 }
 0x136   : > { %v1968_v24 = vpop.f32.mrb[17].mxu0  ;;  %v2663_v25 = vsel %vm670_vm13, %v634_v13, %v702_v19  ;;  %vm671_vm0 = vcmp.gt.f32.partialorder %v637_v21, 0.0  ;;  %v703_v27 = vmul.f32 0.2, %v637_v21 }
 0x137   : > { %v711_v29 = vsel %vm647_vm15, %v541_v18, %v679_v22  ;;  %v1969_v30 = vadd.f32 %v1968_v24, %v1967_v23  ;;  %v1970_v31 = vpop.f32.mrb[18].mxu0 }
 0x138   : > { %v1971_v32 = vpop.f32.mrb[19].mxu0  ;;  %v739_v33 = vpack.c.bf16 %v711_v29, %v710_v28  ;;  %v2665_v34 = vsel %vm671_vm0, %v637_v21, %v703_v27 }
 0x139   : > { %v546_v35 = vadd.f32 %v1969_v30, %v2623_v52  ;;  %v1972_v36 = vadd.f32 %v1971_v32, %v1970_v31  ;;  %v751_v37 = vpack.c.bf16 %v2665_v34, %v2663_v25 }
 0x13a   : > { %2178 = vmatmul.mubr.msk.bf16.gmra.mrb[20].mxu1 %vm768_vm3, %v739_v33 }
 0x13b   : > { %v680_v38 = vmul.f32 0.2, %v546_v35  ;;  %v549_v39 = vadd.f32 %v1972_v36, %v2623_v52  ;;  %vm648_vm1 = vcmp.gt.f32.partialorder %v546_v35, 0.0 }
 0x13d   : > { %vm649_vm2 = vcmp.gt.f32.partialorder %v549_v39, 0.0  ;;  %v681_v40 = vmul.f32 0.2, %v549_v39  ;;  %v1973_v42 = vpop.f32.mrb[20].mxu0  ;;  %v712_v44 = vsel %vm648_vm1, %v546_v35, %v680_v38 }
 0x13e   : > { %v1974_v43 = vpop.f32.mrb[21].mxu0 }
 0x13f   : > { %v713_v45 = vsel %vm649_vm2, %v549_v39, %v681_v40  ;;  %v1975_v47 = vadd.f32 %v1974_v43, %v1973_v42  ;;  %v1976_v48 = vpop.f32.mrb[22].mxu0  ;;  %vm1012_vm2 = vcmask 7168  }
 0x140   : > { %v1977_v49 = vpop.f32.mrb[23].mxu0  ;;  %v740_v50 = vpack.c.bf16 %v713_v45, %v712_v44 }
 0x141   : > { %v554_v51 = vadd.f32 %v1975_v47, %v2623_v52  ;;  %v1978_v54 = vadd.f32 %v1977_v49, %v1976_v48 }
 0x142   : > { %2181 = vmatprep.mubr.msk.bf16.mxu1 %vm768_vm3, %v740_v50 }
 0x143   : > { %v682_v55 = vmul.f32 0.2, %v554_v51  ;;  %v557_v56 = vadd.f32 %v1978_v54, %v2623_v52  ;;  %vm650_vm4 = vcmp.gt.f32.partialorder %v554_v51, 0.0 }
 0x145   : > { %vm651_vm5 = vcmp.gt.f32.partialorder %v557_v56, 0.0  ;;  %v683_v57 = vmul.f32 0.2, %v557_v56  ;;  %v1979_v58 = vpop.f32.mrb[24].mxu0  ;;  %v714_v60 = vsel %vm650_vm4, %v554_v51, %v682_v55 }
 0x146   : > { %v1980_v59 = vpop.f32.mrb[25].mxu0 }
 0x147   : > { %v715_v61 = vsel %vm651_vm5, %v557_v56, %v683_v57  ;;  %v1981_v62 = vadd.f32 %v1980_v59, %v1979_v58  ;;  %v1982_v63 = vpop.f32.mrb[26].mxu0 }
 0x148   : > { %v1983_v0 = vpop.f32.mrb[27].mxu0  ;;  %v741_v1 = vpack.c.bf16 %v715_v61, %v714_v60 }
 0x149   : > { %v562_v2 = vadd.f32 %v1981_v62, %v2623_v52  ;;  %v1984_v3 = vadd.f32 %v1983_v0, %v1982_v63 }
 0x14a   : > { %2182 = vmatmul.mubr.msk.bf16.gmra.mrb[24].mxu1 %vm768_vm3, %v741_v1 }
 0x14b   : > { %v684_v5 = vmul.f32 0.2, %v562_v2  ;;  %v565_v6 = vadd.f32 %v1984_v3, %v2623_v52  ;;  %vm652_vm6 = vcmp.gt.f32.partialorder %v562_v2, 0.0 }
 0x14d   : > { %vm653_vm7 = vcmp.gt.f32.partialorder %v565_v6, 0.0  ;;  %v685_v7 = vmul.f32 0.2, %v565_v6  ;;  %v1985_v8 = vpop.f32.mrb[28].mxu0  ;;  %v716_v11 = vsel %vm652_vm6, %v562_v2, %v684_v5 }
 0x14e   : > { %v1986_v10 = vpop.f32.mrb[29].mxu0 }
 0x14f   : > { %v717_v12 = vsel %vm653_vm7, %v565_v6, %v685_v7  ;;  %v1987_v13 = vadd.f32 %v1986_v10, %v1985_v8  ;;  %v1988_v14 = vpop.f32.mrb[30].mxu0 }
 0x150   : > { %v1989_v17 = vpop.f32.mrb[31].mxu0  ;;  %v742_v18 = vpack.c.bf16 %v717_v12, %v716_v11 }
 0x151   : > { %v570_v19 = vadd.f32 %v1987_v13, %v2623_v52  ;;  %v1990_v21 = vadd.f32 %v1989_v17, %v1988_v14 }
 0x152   : > { %2185 = vmatprep.mubr.msk.bf16.mxu1 %vm768_vm3, %v742_v18 }
 0x153   : > { %v686_v22 = vmul.f32 0.2, %v570_v19  ;;  %v573_v23 = vadd.f32 %v1990_v21, %v2623_v52  ;;  %vm654_vm8 = vcmp.gt.f32.partialorder %v570_v19, 0.0 }
 0x155   : > { %vm655_vm9 = vcmp.gt.f32.partialorder %v573_v23, 0.0  ;;  %v687_v24 = vmul.f32 0.2, %v573_v23  ;;  %v1991_v27 = vpop.f32.mrb[32].mxu0  ;;  %v718_v29 = vsel %vm654_vm8, %v570_v19, %v686_v22 }
 0x156   : > { %v1992_v28 = vpop.f32.mrb[33].mxu0 }
 0x157   : > { %v719_v30 = vsel %vm655_vm9, %v573_v23, %v687_v24  ;;  %v1993_v31 = vadd.f32 %v1992_v28, %v1991_v27  ;;  %v1994_v32 = vpop.f32.mrb[34].mxu0 }
 0x158   : > { %v1995_v33 = vpop.f32.mrb[35].mxu0  ;;  %v743_v35 = vpack.c.bf16 %v719_v30, %v718_v29 }
 0x159   : > { %v578_v36 = vadd.f32 %v1993_v31, %v2623_v52  ;;  %v1996_v38 = vadd.f32 %v1995_v33, %v1994_v32 }
 0x15a   : > { %2186 = vmatmul.mubr.msk.bf16.gmra.mrb[28].mxu1 %vm768_vm3, %v743_v35 }
 0x15b   : > { %v688_v39 = vmul.f32 0.2, %v578_v36  ;;  %v581_v40 = vadd.f32 %v1996_v38, %v2623_v52  ;;  %vm656_vm10 = vcmp.gt.f32.partialorder %v578_v36, 0.0 }
 0x15d   : > { %vm657_vm11 = vcmp.gt.f32.partialorder %v581_v40, 0.0  ;;  %v689_v42 = vmul.f32 0.2, %v581_v40  ;;  %v1997_v43 = vpop.f32.mrb[36].mxu0  ;;  %v720_v45 = vsel %vm656_vm10, %v578_v36, %v688_v39 }
 0x15e   : > { %v1998_v44 = vpop.f32.mrb[37].mxu0 }
 0x15f   : > { %v721_v47 = vsel %vm657_vm11, %v581_v40, %v689_v42  ;;  %v1999_v48 = vadd.f32 %v1998_v44, %v1997_v43  ;;  %v2000_v49 = vpop.f32.mrb[38].mxu0 }
 0x160   : > { %v2001_v50 = vpop.f32.mrb[39].mxu0  ;;  %v744_v51 = vpack.c.bf16 %v721_v47, %v720_v45 }
 0x161   : > { %v586_v54 = vadd.f32 %v1999_v48, %v2623_v52  ;;  %v2002_v55 = vadd.f32 %v2001_v50, %v2000_v49 }
 0x162   : > { %2189 = vmatprep.mubr.msk.bf16.mxu1 %vm768_vm3, %v744_v51 }
 0x163   : > { %v690_v56 = vmul.f32 0.2, %v586_v54  ;;  %v589_v57 = vadd.f32 %v2002_v55, %v2623_v52  ;;  %vm658_vm12 = vcmp.gt.f32.partialorder %v586_v54, 0.0 }
 0x165   : > { %vm659_vm13 = vcmp.gt.f32.partialorder %v589_v57, 0.0  ;;  %v691_v58 = vmul.f32 0.2, %v589_v57  ;;  %v2003_v59 = vpop.f32.mrb[40].mxu0  ;;  %v722_v61 = vsel %vm658_vm12, %v586_v54, %v690_v56 }
 0x166   : > { %v2004_v60 = vpop.f32.mrb[41].mxu0 }
 0x167   : > { %v723_v62 = vsel %vm659_vm13, %v589_v57, %v691_v58  ;;  %v2005_v63 = vadd.f32 %v2004_v60, %v2003_v59  ;;  %v2006_v0 = vpop.f32.mrb[42].mxu0 }
 0x168   : > { %v2007_v1 = vpop.f32.mrb[43].mxu0  ;;  %v745_v2 = vpack.c.bf16 %v723_v62, %v722_v61 }
 0x169   : > { %v594_v3 = vadd.f32 %v2005_v63, %v2623_v52  ;;  %v2008_v5 = vadd.f32 %v2007_v1, %v2006_v0 }
 0x16a   : > { %2190 = vmatmul.mubr.msk.bf16.gmra.mrb[32].mxu1 %vm768_vm3, %v745_v2 }
 0x16b   : > { %v692_v6 = vmul.f32 0.2, %v594_v3  ;;  %v597_v7 = vadd.f32 %v2008_v5, %v2623_v52  ;;  %vm660_vm14 = vcmp.gt.f32.partialorder %v594_v3, 0.0 }
 0x16d   : > { %vm661_vm15 = vcmp.gt.f32.partialorder %v597_v7, 0.0  ;;  %v693_v8 = vmul.f32 0.2, %v597_v7  ;;  %v2009_v10 = vpop.f32.mrb[44].mxu0  ;;  %v724_v12 = vsel %vm660_vm14, %v594_v3, %v692_v6 }
 0x16e   : > { %v2010_v11 = vpop.f32.mrb[45].mxu0 }
 0x16f   : > { %v725_v13 = vsel %vm661_vm15, %v597_v7, %v693_v8  ;;  %v2011_v14 = vadd.f32 %v2010_v11, %v2009_v10  ;;  %v2012_v17 = vpop.f32.mrb[46].mxu0 }
 0x170   : > { %v2013_v18 = vpop.f32.mrb[47].mxu0  ;;  %v746_v19 = vpack.c.bf16 %v725_v13, %v724_v12 }
 0x171   : > { %v602_v21 = vadd.f32 %v2011_v14, %v2623_v52  ;;  %v2014_v22 = vadd.f32 %v2013_v18, %v2012_v17 }
 0x172   : > { %2193 = vmatprep.mubr.msk.bf16.mxu1 %vm768_vm3, %v746_v19 }
 0x173   : > { %v694_v23 = vmul.f32 0.2, %v602_v21  ;;  %v605_v24 = vadd.f32 %v2014_v22, %v2623_v52  ;;  %vm662_vm0 = vcmp.gt.f32.partialorder %v602_v21, 0.0  ;;  %v2464_v52 = vmov 0.0  }
 0x174   : > { %1013 = vst.msk [vmem:[%s2534_s10] sm:$0xff] %vm1012_vm2, %v2464_v52  ;;  %1014 = vst.msk [vmem:[%s2534_s10 + $0x8] sm:$0xff] %vm1012_vm2, %v2464_v52 }
 0x175   : > { %vm663_vm1 = vcmp.gt.f32.partialorder %v605_v24, 0.0  ;;  %v695_v27 = vmul.f32 0.2, %v605_v24  ;;  %v726_v28 = vsel %vm662_vm0, %v602_v21, %v694_v23  ;;  %1015 = vst.msk [vmem:[%s2534_s10 + $0x10] sm:$0xff] %vm1012_vm2, %v2464_v52  ;;  %1016 = vst.msk [vmem:[%s2534_s10 + $0x18] sm:$0xff] %vm1012_vm2, %v2464_v52 }
 0x176   : > { %1017 = vst.msk [vmem:[%s2534_s10 + $0x20] sm:$0xff] %vm1012_vm2, %v2464_v52  ;;  %1018 = vst.msk [vmem:[%s2534_s10 + $0x28] sm:$0xff] %vm1012_vm2, %v2464_v52 }
 0x177   : > { %v727_v29 = vsel %vm663_vm1, %v605_v24, %v695_v27  ;;  %1019 = vst.msk [vmem:[%s2534_s10 + $0x30] sm:$0xff] %vm1012_vm2, %v2464_v52  ;;  %1020 = vst.msk [vmem:[%s2534_s10 + $0x38] sm:$0xff] %vm1012_vm2, %v2464_v52 }
 0x178   : > { %v747_v30 = vpack.c.bf16 %v727_v29, %v726_v28  ;;  %1021 = vst.msk [vmem:[%s2534_s10 + $0x40] sm:$0xff] %vm1012_vm2, %v2464_v52  ;;  %1022 = vst.msk [vmem:[%s2534_s10 + $0x48] sm:$0xff] %vm1012_vm2, %v2464_v52 }
 0x179   : > { %1023 = vst.msk [vmem:[%s2534_s10 + $0x50] sm:$0xff] %vm1012_vm2, %v2464_v52  ;;  %1024 = vst.msk [vmem:[%s2534_s10 + $0x58] sm:$0xff] %vm1012_vm2, %v2464_v52 }
 0x17a   : > { %2194 = vmatmul.mubr.msk.bf16.gmra.mrb[36].mxu1 %vm768_vm3, %v747_v30  ;;  %1025 = vst.msk [vmem:[%s2534_s10 + $0x60] sm:$0xff] %vm1012_vm2, %v2464_v52  ;;  %1026 = vst.msk [vmem:[%s2534_s10 + $0x68] sm:$0xff] %vm1012_vm2, %v2464_v52 }
 0x17b   : > { %2197 = vmatprep.mubr.msk.bf16.mxu1 %vm768_vm3, %v748_v26  ;;  %1027 = vst.msk [vmem:[%s2534_s10 + $0x70] sm:$0xff] %vm1012_vm2, %v2464_v52  ;;  %1028 = vst.msk [vmem:[%s2534_s10 + $0x78] sm:$0xff] %vm1012_vm2, %v2464_v52 }
 0x17c   : > { %1029 = vst.msk [vmem:[%s2534_s10 + $0x80] sm:$0xff] %vm1012_vm2, %v2464_v52  ;;  %1030 = vst.msk [vmem:[%s2534_s10 + $0x88] sm:$0xff] %vm1012_vm2, %v2464_v52 }
 0x17d   : > { %1031 = vst.msk [vmem:[%s2534_s10 + $0x90] sm:$0xff] %vm1012_vm2, %v2464_v52  ;;  %1032 = vst.msk [vmem:[%s2534_s10 + $0x98] sm:$0xff] %vm1012_vm2, %v2464_v52 }
 0x17e   : > { %1033 = vst.msk [vmem:[%s2534_s10 + $0xa0] sm:$0xff] %vm1012_vm2, %v2464_v52  ;;  %1034 = vst.msk [vmem:[%s2534_s10 + $0xa8] sm:$0xff] %vm1012_vm2, %v2464_v52 }
 0x17f   : > { %1035 = vst.msk [vmem:[%s2534_s10 + $0xb0] sm:$0xff] %vm1012_vm2, %v2464_v52  ;;  %1036 = vst.msk [vmem:[%s2534_s10 + $0xb8] sm:$0xff] %vm1012_vm2, %v2464_v52 }
 0x180   : > { %1037 = vst.msk [vmem:[%s2534_s10 + $0xc0] sm:$0xff] %vm1012_vm2, %v2464_v52  ;;  %1038 = vst.msk [vmem:[%s2534_s10 + $0xc8] sm:$0xff] %vm1012_vm2, %v2464_v52 }
 0x181   : > { %1039 = vst.msk [vmem:[%s2534_s10 + $0xd0] sm:$0xff] %vm1012_vm2, %v2464_v52  ;;  %1040 = vst.msk [vmem:[%s2534_s10 + $0xd8] sm:$0xff] %vm1012_vm2, %v2464_v52 }
 0x182   : > { %2198 = vmatmul.mubr.msk.bf16.gmra.mrb[40].mxu1 %vm768_vm3, %v749_v53  ;;  %1041 = vst.msk [vmem:[%s2534_s10 + $0xe0] sm:$0xff] %vm1012_vm2, %v2464_v52  ;;  %1042 = vst.msk [vmem:[%s2534_s10 + $0xe8] sm:$0xff] %vm1012_vm2, %v2464_v52 }
 0x183   : > { %2201 = vmatprep.mubr.msk.bf16.mxu1 %vm768_vm3, %v750_v16  ;;  %1043 = vst.msk [vmem:[%s2534_s10 + $0xf0] sm:$0xff] %vm1012_vm2, %v2464_v52  ;;  %1044 = vst.msk [vmem:[%s2534_s10 + $0xf8] sm:$0xff] %vm1012_vm2, %v2464_v52 }
 0x18a   : > { %2202 = vmatmul.mubr.msk.bf16.gmra.mrb[44].mxu1 %vm768_vm3, %v751_v37 }
 0x1fd   : > { %v2175_v15 = vpop.f32.mrb[16].mxu1 }
 0x1fe   : > { %v851_v20 = vpop.f32.mrb[17].mxu1 }
 0x1ff   : > { %v2176_v26 = vpop.f32.mrb[18].mxu1 }
 0x200   : > { %v979_v41 = vpack.c.bf16 %v2176_v26, %v2175_v15  ;;  %v854_v46 = vpop.f32.mrb[19].mxu1 }
 0x201   : > { %v978_v53 = vpack.c.bf16 %v854_v46, %v851_v20 }
 0x202   : > { %997 = vst.msk [vmem:[#allocation3 + $0x8] sm:$0xff] %vm768_vm3, %v979_v41 }
 0x203   : > { %996 = vst.msk [vmem:[#allocation3] sm:$0xff] %vm768_vm3, %v978_v53 }
 0x20d   : > { %v2179_v4 = vpop.f32.mrb[20].mxu1 }
 0x20e   : > { %v867_v9 = vpop.f32.mrb[21].mxu1 }
 0x20f   : > { %v2180_v16 = vpop.f32.mrb[22].mxu1 }
 0x210   : > { %v981_v25 = vpack.c.bf16 %v2180_v16, %v2179_v4  ;;  %v870_v34 = vpop.f32.mrb[23].mxu1 }
 0x211   : > { %v980_v37 = vpack.c.bf16 %v870_v34, %v867_v9 }
 0x212   : > { %999 = vst.msk [vmem:[#allocation3 + $0x18] sm:$0xff] %vm768_vm3, %v981_v25 }
 0x213   : > { %998 = vst.msk [vmem:[#allocation3 + $0x10] sm:$0xff] %vm768_vm3, %v980_v37 }
 0x21d   : > { %v2183_v31 = vpop.f32.mrb[24].mxu1 }
 0x21e   : > { %v883_v32 = vpop.f32.mrb[25].mxu1 }
 0x21f   : > { %v2184_v33 = vpop.f32.mrb[26].mxu1 }
 0x220   : > { %v983_v35 = vpack.c.bf16 %v2184_v33, %v2183_v31  ;;  %v886_v36 = vpop.f32.mrb[27].mxu1 }
 0x221   : > { %v982_v38 = vpack.c.bf16 %v886_v36, %v883_v32 }
 0x222   : > { %1001 = vst.msk [vmem:[#allocation3 + $0x28] sm:$0xff] %vm768_vm3, %v983_v35 }
 0x223   : > { %1000 = vst.msk [vmem:[#allocation3 + $0x20] sm:$0xff] %vm768_vm3, %v982_v38 }
 0x22d   : > { %v2187_v39 = vpop.f32.mrb[28].mxu1 }
 0x22e   : > { %v899_v40 = vpop.f32.mrb[29].mxu1 }
 0x22f   : > { %v2188_v42 = vpop.f32.mrb[30].mxu1 }
 0x230   : > { %v985_v43 = vpack.c.bf16 %v2188_v42, %v2187_v39  ;;  %v902_v44 = vpop.f32.mrb[31].mxu1 }
 0x231   : > { %v984_v45 = vpack.c.bf16 %v902_v44, %v899_v40 }
 0x232   : > { %1003 = vst.msk [vmem:[#allocation3 + $0x38] sm:$0xff] %vm768_vm3, %v985_v43 }
 0x233   : > { %1002 = vst.msk [vmem:[#allocation3 + $0x30] sm:$0xff] %vm768_vm3, %v984_v45 }
 0x23d   : > { %v2191_v47 = vpop.f32.mrb[32].mxu1 }
 0x23e   : > { %v915_v48 = vpop.f32.mrb[33].mxu1 }
 0x23f   : > { %v2192_v49 = vpop.f32.mrb[34].mxu1 }
 0x240   : > { %v987_v50 = vpack.c.bf16 %v2192_v49, %v2191_v47  ;;  %v918_v51 = vpop.f32.mrb[35].mxu1 }
 0x241   : > { %v986_v54 = vpack.c.bf16 %v918_v51, %v915_v48 }
 0x242   : > { %1005 = vst.msk [vmem:[#allocation3 + $0x48] sm:$0xff] %vm768_vm3, %v987_v50 }
 0x243   : > { %1004 = vst.msk [vmem:[#allocation3 + $0x40] sm:$0xff] %vm768_vm3, %v986_v54 }
 0x24d   : > { %v2195_v55 = vpop.f32.mrb[36].mxu1 }
 0x24e   : > { %v931_v56 = vpop.f32.mrb[37].mxu1 }
 0x24f   : > { %v2196_v57 = vpop.f32.mrb[38].mxu1 }
 0x250   : > { %v989_v58 = vpack.c.bf16 %v2196_v57, %v2195_v55  ;;  %v934_v59 = vpop.f32.mrb[39].mxu1 }
 0x251   : > { %v988_v60 = vpack.c.bf16 %v934_v59, %v931_v56 }
 0x252   : > { %1007 = vst.msk [vmem:[#allocation3 + $0x58] sm:$0xff] %vm768_vm3, %v989_v58 }
 0x253   : > { %1006 = vst.msk [vmem:[#allocation3 + $0x50] sm:$0xff] %vm768_vm3, %v988_v60 }
 0x255   : > { %v2199_v61 = vpop.f32.mrb[40].mxu1 }
 0x256   : > { %v947_v62 = vpop.f32.mrb[41].mxu1 }
 0x257   : > { %v2200_v63 = vpop.f32.mrb[42].mxu1 }
 0x258   : > { %v991_v0 = vpack.c.bf16 %v2200_v63, %v2199_v61  ;;  %v950_v1 = vpop.f32.mrb[43].mxu1 }
 0x259   : > { %v990_v2 = vpack.c.bf16 %v950_v1, %v947_v62 }
 0x25a   : > { %1009 = vst.msk [vmem:[#allocation3 + $0x68] sm:$0xff] %vm768_vm3, %v991_v0 }
 0x25b   : > { %1008 = vst.msk [vmem:[#allocation3 + $0x60] sm:$0xff] %vm768_vm3, %v990_v2 }
 0x25d   : > { %v2203_v3 = vpop.f32.mrb[44].mxu1 }
 0x25e   : > { %v963_v5 = vpop.f32.mrb[45].mxu1 }
 0x25f   : > { %v2204_v6 = vpop.f32.mrb[46].mxu1 }
 0x260   : > { %v993_v7 = vpack.c.bf16 %v2204_v6, %v2203_v3  ;;  %v966_v8 = vpop.f32.mrb[47].mxu1 }
 0x261   : > { %v992_v10 = vpack.c.bf16 %v966_v8, %v963_v5 }
 0x262   : > { %1011 = vst.msk [vmem:[#allocation3 + $0x78] sm:$0xff] %vm768_vm3, %v993_v7 }
 0x263   : > { %1010 = vst.msk [vmem:[#allocation3 + $0x70] sm:$0xff] %vm768_vm3, %v992_v10 }
 0x264 PF: > { %p1887_p7 = scmp.ne.s32.totalorder %s2446_s26, 1 }
 0x265   : > { %v1094_v11 = vld [vmem:[#allocation3 + $0x40] sm:$0xff] (!%p1887_p7)  ;;  %v1095_v13 = vld [vmem:[#allocation3 + $0x48] sm:$0xff] (!%p1887_p7)  ;;  %v1096_v17 = vld [vmem:[#allocation3 + $0x50] sm:$0xff] (!%p1887_p7)  ;;  %vm1405_vm4 = vcmask (!%p1887_p7), 261120   ;;  %s1502_s9 = sld [smem:[#allocation5]] (!%p1887_p7) }
 0x266   : > { %1048 = sbr.rel (%p1887_p7) target bundleno = 1106 (0x452), region = 56  ;;  %v1086_v12 = vld [vmem:[#allocation3] sm:$0xff] (!%p1887_p7)  ;;  %2057 = vmatprep.subr.bf16.mxu0 (!%p1887_p7), %v1094_v11  ;;  %2221 = vmatprep.subr.bf16.mxu1 (!%p1887_p7), %v1094_v11  ;;  %v1087_v14 = vld [vmem:[#allocation3 + $0x8] sm:$0xff] (!%p1887_p7)  ;;  %v1088_v21 = vld [vmem:[#allocation3 + $0x10] sm:$0xff] (!%p1887_p7) }
 0x267   : > { %2058 = vmatpush3.bf16.msra.mxu0 (!%p1887_p7), %v1086_v12  ;;  %2229 = vmatpush3.bf16.msra.mxu1 (!%p1887_p7), %v1086_v12  ;;  %v1055_v18 = vld [vmem:[#allocation2 + $0x8] sm:$0xff] (!%p1887_p7)  ;;  %v1097_v22 = vld [vmem:[#allocation3 + $0x58] sm:$0xff] (!%p1887_p7)  ;;  %v1098_v24 = vld [vmem:[#allocation3 + $0x60] sm:$0xff] (!%p1887_p7) }
 0x268   : > { %2059 = vmatprep.subr.bf16.mxu0 (!%p1887_p7), %v1095_v13  ;;  %2222 = vmatprep.subr.bf16.mxu1 (!%p1887_p7), %v1095_v13  ;;  %v1071_v19 = vld [vmem:[#allocation2 + $0x88] sm:$0xff] (!%p1887_p7)  ;;  %v1089_v23 = vld [vmem:[#allocation3 + $0x18] sm:$0xff] (!%p1887_p7)  ;;  %v1090_v27 = vld [vmem:[#allocation3 + $0x20] sm:$0xff] (!%p1887_p7) }
 0x269   : > { %1141 = vmatprep.mubr.bf16.mxu0 (!%p1887_p7), %v1055_v18  ;;  %1205 = vmatprep.mubr.bf16.mxu1 (!%p1887_p7), %v1071_v19  ;;  %v1099_v28 = vld [vmem:[#allocation3 + $0x68] sm:$0xff] (!%p1887_p7)  ;;  %v1092_v52 = vld [vmem:[#allocation3 + $0x30] sm:$0xff] (!%p1887_p7)  ;;  %v1101_v15 = vld [vmem:[#allocation3 + $0x78] sm:$0xff] (!%p1887_p7) }
 0x26a   : > { %v1091_v29 = vld [vmem:[#allocation3 + $0x28] sm:$0xff] (!%p1887_p7)  ;;  %v1100_v30 = vld [vmem:[#allocation3 + $0x70] sm:$0xff] (!%p1887_p7)  ;;  %v1093_v20 = vld [vmem:[#allocation3 + $0x38] sm:$0xff] (!%p1887_p7) }
 0x26b   : > { %2060 = vmatpush3.bf16.msra.mxu0 (!%p1887_p7), %v1087_v14  ;;  %2230 = vmatpush3.bf16.msra.mxu1 (!%p1887_p7), %v1087_v14  ;;  %v1054_v26 = vld [vmem:[#allocation2] sm:$0xff] (!%p1887_p7)  ;;  %v1057_v46 = vld [vmem:[#allocation2 + $0x18] sm:$0xff] (!%p1887_p7)  ;;  %v1056_v4 = vld [vmem:[#allocation2 + $0x10] sm:$0xff] (!%p1887_p7) }
 0x26c   : > { %2061 = vmatprep.subr.bf16.mxu0 (!%p1887_p7), %v1096_v17  ;;  %2223 = vmatprep.subr.bf16.mxu1 (!%p1887_p7), %v1096_v17  ;;  %v1070_v41 = vld [vmem:[#allocation2 + $0x80] sm:$0xff] (!%p1887_p7)  ;;  %v1073_v53 = vld [vmem:[#allocation2 + $0x98] sm:$0xff] (!%p1887_p7)  ;;  %v1072_v9 = vld [vmem:[#allocation2 + $0x90] sm:$0xff] (!%p1887_p7) }
 0x26d   : > { %v1059_v16 = vld [vmem:[#allocation2 + $0x28] sm:$0xff]  ;;  %v1058_v34 = vld [vmem:[#allocation2 + $0x20] sm:$0xff]  ;;  %v1061_v31 = vld [vmem:[#allocation2 + $0x38] sm:$0xff] }
 0x26e   : > { %v1075_v25 = vld [vmem:[#allocation2 + $0xa8] sm:$0xff]  ;;  %v1074_v37 = vld [vmem:[#allocation2 + $0xa0] sm:$0xff]  ;;  %v1077_v32 = vld [vmem:[#allocation2 + $0xb8] sm:$0xff] }
 0x26f   : > { %2062 = vmatpush3.bf16.msra.mxu0 %v1088_v21  ;;  %2231 = vmatpush3.bf16.msra.mxu1 %v1088_v21  ;;  %v1060_v33 = vld [vmem:[#allocation2 + $0x30] sm:$0xff]  ;;  %v1063_v36 = vld [vmem:[#allocation2 + $0x48] sm:$0xff]  ;;  %v1062_v39 = vld [vmem:[#allocation2 + $0x40] sm:$0xff] }
 0x270   : > { %2063 = vmatprep.subr.bf16.mxu0 %v1097_v22  ;;  %2224 = vmatprep.subr.bf16.mxu1 %v1097_v22  ;;  %v1076_v35 = vld [vmem:[#allocation2 + $0xb0] sm:$0xff]  ;;  %v1079_v38 = vld [vmem:[#allocation2 + $0xc8] sm:$0xff]  ;;  %v1078_v40 = vld [vmem:[#allocation2 + $0xc0] sm:$0xff] }
 0x271   : > { %v1065_v42 = vld [vmem:[#allocation2 + $0x58] sm:$0xff]  ;;  %v1064_v44 = vld [vmem:[#allocation2 + $0x50] sm:$0xff]  ;;  %v1067_v47 = vld [vmem:[#allocation2 + $0x68] sm:$0xff] }
 0x272   : > { %v1081_v43 = vld [vmem:[#allocation2 + $0xd8] sm:$0xff]  ;;  %v1080_v45 = vld [vmem:[#allocation2 + $0xd0] sm:$0xff]  ;;  %v1083_v48 = vld [vmem:[#allocation2 + $0xe8] sm:$0xff] }
 0x273   : > { %2064 = vmatpush3.bf16.msra.mxu0 %v1089_v23  ;;  %2232 = vmatpush3.bf16.msra.mxu1 %v1089_v23  ;;  %v1066_v49 = vld [vmem:[#allocation2 + $0x60] sm:$0xff]  ;;  %v1069_v51 = vld [vmem:[#allocation2 + $0x78] sm:$0xff]  ;;  %v1068_v55 = vld [vmem:[#allocation2 + $0x70] sm:$0xff] }
 0x274   : > { %2065 = vmatprep.subr.bf16.mxu0 %v1098_v24  ;;  %2225 = vmatprep.subr.bf16.mxu1 %v1098_v24  ;;  %v1082_v50 = vld [vmem:[#allocation2 + $0xe0] sm:$0xff]  ;;  %v1085_v54 = vld [vmem:[#allocation2 + $0xf8] sm:$0xff]  ;;  %v1084_v56 = vld [vmem:[#allocation2 + $0xf0] sm:$0xff] }
 0x275   : > { %v2794_v59 = vld [vmem:[%s3008_s4] ss:$0 sm:$0xff] }
 0x276   : > { %v2803_v14 = vld [vmem:[%s3009_s5] ss:$0 sm:$0xff] }
 0x277   : > { %2066 = vmatpush3.bf16.msra.mxu0 %v1090_v27  ;;  %2233 = vmatpush3.bf16.msra.mxu1 %v1090_v27 }
 0x278   : > { %2067 = vmatprep.subr.bf16.mxu0 %v1099_v28  ;;  %2226 = vmatprep.subr.bf16.mxu1 %v1099_v28 }
 0x27b   : > { %2068 = vmatpush3.bf16.msra.mxu0 %v1091_v29  ;;  %2234 = vmatpush3.bf16.msra.mxu1 %v1091_v29 }
 0x27c   : > { %2069 = vmatprep.subr.bf16.mxu0 %v1100_v30  ;;  %2227 = vmatprep.subr.bf16.mxu1 %v1100_v30 }
 0x27f   : > { %2070 = vmatpush3.bf16.msra.mxu0 %v1092_v52  ;;  %2235 = vmatpush3.bf16.msra.mxu1 %v1092_v52 }
 0x280   : > { %2071 = vmatprep.subr.bf16.mxu0 %v1101_v15  ;;  %2228 = vmatprep.subr.bf16.mxu1 %v1101_v15 }
 0x283   : > { %2072 = vmatpush3.bf16.msra.mxu0 %v1093_v20  ;;  %2236 = vmatpush3.bf16.msra.mxu1 %v1093_v20 }
 0x286   : > { %1142 = vmatmul.mubr.bf16.vlgmr.msra.gmra.mrb[0].mxu0 %v1054_v26  ;;  %1206 = vmatmul.mubr.bf16.vlgmr.msra.gmra.mrb[0].mxu1 %v1070_v41 }
 0x287   : > { %1149 = vmatprep.mubr.bf16.mxu0 %v1057_v46  ;;  %1213 = vmatprep.mubr.bf16.mxu1 %v1073_v53 }
 0x28e   : > { %1150 = vmatmul.mubr.bf16.gmra.mrb[4].mxu0 %v1056_v4  ;;  %1214 = vmatmul.mubr.bf16.gmra.mrb[4].mxu1 %v1072_v9 }
 0x28f   : > { %1157 = vmatprep.mubr.bf16.mxu0 %v1059_v16  ;;  %1221 = vmatprep.mubr.bf16.mxu1 %v1075_v25 }
 0x296   : > { %1158 = vmatmul.mubr.bf16.gmra.mrb[8].mxu0 %v1058_v34  ;;  %1222 = vmatmul.mubr.bf16.gmra.mrb[8].mxu1 %v1074_v37 }
 0x297   : > { %1165 = vmatprep.mubr.bf16.mxu0 %v1061_v31  ;;  %1229 = vmatprep.mubr.bf16.mxu1 %v1077_v32 }
 0x29e   : > { %1166 = vmatmul.mubr.bf16.gmra.mrb[12].mxu0 %v1060_v33  ;;  %1230 = vmatmul.mubr.bf16.gmra.mrb[12].mxu1 %v1076_v35 }
 0x29f   : > { %1173 = vmatprep.mubr.bf16.mxu0 %v1063_v36  ;;  %1237 = vmatprep.mubr.bf16.mxu1 %v1079_v38 }
 0x2a6   : > { %1174 = vmatmul.mubr.bf16.gmra.mrb[16].mxu0 %v1062_v39  ;;  %1238 = vmatmul.mubr.bf16.gmra.mrb[16].mxu1 %v1078_v40 }
 0x2a7   : > { %1181 = vmatprep.mubr.bf16.mxu0 %v1065_v42  ;;  %1245 = vmatprep.mubr.bf16.mxu1 %v1081_v43 }
 0x2ae   : > { %1182 = vmatmul.mubr.bf16.gmra.mrb[20].mxu0 %v1064_v44  ;;  %1246 = vmatmul.mubr.bf16.gmra.mrb[20].mxu1 %v1080_v45 }
 0x2af   : > { %1189 = vmatprep.mubr.bf16.mxu0 %v1067_v47  ;;  %1253 = vmatprep.mubr.bf16.mxu1 %v1083_v48 }
 0x2b6   : > { %1190 = vmatmul.mubr.bf16.gmra.mrb[24].mxu0 %v1066_v49  ;;  %1254 = vmatmul.mubr.bf16.gmra.mrb[24].mxu1 %v1082_v50 }
 0x2b7   : > { %1197 = vmatprep.mubr.bf16.mxu0 %v1069_v51  ;;  %1261 = vmatprep.mubr.bf16.mxu1 %v1085_v54 }
 0x2be   : > { %1198 = vmatmul.mubr.bf16.gmra.mrb[28].mxu0 %v1068_v55  ;;  %1262 = vmatmul.mubr.bf16.gmra.mrb[28].mxu1 %v1084_v56 }
 0x359   : > { %v2073_v57 = vpop.f32.mrb[0].mxu0  ;;  %v2121_v58 = vpop.f32.mrb[0].mxu1 }
 0x35a   : > { %v2074_v60 = vpop.f32.mrb[1].mxu0  ;;  %v2122_v61 = vpop.f32.mrb[1].mxu1 }
 0x35b   : > { %v2075_v62 = vadd.f32 %v2074_v60, %v2073_v57  ;;  %v2123_v63 = vadd.f32 %v2122_v61, %v2121_v58  ;;  %v2076_v0 = vpop.f32.mrb[2].mxu0  ;;  %v2124_v1 = vpop.f32.mrb[2].mxu1 }
 0x35c   : > { %v2077_v2 = vpop.f32.mrb[3].mxu0  ;;  %v2125_v3 = vpop.f32.mrb[3].mxu1 }
 0x35d   : > { %v1144_v5 = vadd.f32 %v2075_v62, %v2794_v59  ;;  %v1208_v6 = vadd.f32 %v2123_v63, %v2794_v59  ;;  %v2078_v7 = vadd.f32 %v2077_v2, %v2076_v0  ;;  %v2126_v8 = vadd.f32 %v2125_v3, %v2124_v1 }
 0x35f   : > { %v1302_v10 = vmul.f32 0.2, %v1144_v5  ;;  %v1318_v11 = vmul.f32 0.2, %v1208_v6  ;;  %v1147_v12 = vadd.f32 %v2078_v7, %v2794_v59  ;;  %v1211_v13 = vadd.f32 %v2126_v8, %v2794_v59 }
 0x360   : > { %vm1270_vm3 = vcmp.gt.f32.partialorder %v1144_v5, 0.0  ;;  %vm1286_vm5 = vcmp.gt.f32.partialorder %v1208_v6, 0.0 }
 0x361   : > { %v1303_v17 = vmul.f32 0.2, %v1147_v12  ;;  %v1319_v18 = vmul.f32 0.2, %v1211_v13  ;;  %v2079_v19 = vpop.f32.mrb[4].mxu0  ;;  %v2127_v21 = vpop.f32.mrb[4].mxu1  ;;  %v1334_v22 = vsel %vm1270_vm3, %v1144_v5, %v1302_v10  ;;  %v1350_v23 = vsel %vm1286_vm5, %v1208_v6, %v1318_v11 }
 0x362   : > { %v2080_v24 = vpop.f32.mrb[5].mxu0  ;;  %v2128_v27 = vpop.f32.mrb[5].mxu1  ;;  %v1373_v28 = vmul.f32 %v2803_v14, %v1334_v22  ;;  %vm1287_vm6 = vcmp.gt.f32.partialorder %v1211_v13, 0.0  ;;  %vm1271_vm7 = vcmp.gt.f32.partialorder %v1147_v12, 0.0  ;;  %v1389_v4 = vmul.f32 %v2803_v14, %v1350_v23 }
 0x363   : > { %v2081_v29 = vadd.f32 %v2080_v24, %v2079_v19  ;;  %v2082_v30 = vpop.f32.mrb[6].mxu0  ;;  %v2129_v52 = vadd.f32 %v2128_v27, %v2127_v21  ;;  %v2130_v15 = vpop.f32.mrb[6].mxu1  ;;  %v1351_v20 = vsel %vm1287_vm6, %v1211_v13, %v1319_v18  ;;  %v1335_v9 = vsel %vm1271_vm7, %v1147_v12, %v1303_v17 }
 0x364   : > { %v2083_v26 = vpop.f32.mrb[7].mxu0  ;;  %v2131_v41 = vpop.f32.mrb[7].mxu1  ;;  %v1406_v46 = vsel %vm1405_vm4, %v1373_v28, 0.0  ;;  %v1390_v53 = vmul.f32 %v2803_v14, %v1351_v20  ;;  %v1454_v38 = vsel %vm1405_vm4, %v1389_v4, 0.0  ;;  %v1374_v39 = vmul.f32 %v2803_v14, %v1335_v9 }
 0x365   : > { %v1152_v16 = vadd.f32 %v2081_v29, %v2794_v59  ;;  %v1216_v25 = vadd.f32 %v2129_v52, %v2794_v59  ;;  %v2084_v34 = vadd.f32 %v2083_v26, %v2082_v30  ;;  %v2132_v37 = vadd.f32 %v2131_v41, %v2130_v15  ;;  %1407 = vadd.xlane.f32.xlu0 %v1406_v46 }
 0x366   : > { %v1457_v31 = vsel %vm1405_vm4, %v1390_v53, 0.0  ;;  %v1409_v63 = vsel %vm1405_vm4, %v1374_v39, 0.0 }
 0x367   : > { %v1304_v32 = vmul.f32 0.2, %v1152_v16  ;;  %v1320_v33 = vmul.f32 0.2, %v1216_v25  ;;  %v1155_v35 = vadd.f32 %v2084_v34, %v2794_v59  ;;  %v1219_v36 = vadd.f32 %v2132_v37, %v2794_v59  ;;  %1458 = vadd.xlane.f32.xlu1 %v1457_v31 }
 0x368   : > { %vm1272_vm8 = vcmp.gt.f32.partialorder %v1152_v16, 0.0  ;;  %vm1288_vm9 = vcmp.gt.f32.partialorder %v1216_v25, 0.0 }
 0x369   : > { %v1305_v40 = vmul.f32 0.2, %v1155_v35  ;;  %v1321_v42 = vmul.f32 0.2, %v1219_v36  ;;  %v2085_v43 = vpop.f32.mrb[8].mxu0  ;;  %1455 = vadd.xlane.f32.xlu0 %v1454_v38  ;;  %v2133_v44 = vpop.f32.mrb[8].mxu1  ;;  %v1336_v45 = vsel %vm1272_vm8, %v1152_v16, %v1304_v32  ;;  %v1352_v47 = vsel %vm1288_vm9, %v1216_v25, %v1320_v33 }
 0x36a   : > { %v2086_v48 = vpop.f32.mrb[9].mxu0  ;;  %v2134_v49 = vpop.f32.mrb[9].mxu1  ;;  %v1375_v50 = vmul.f32 %v2803_v14, %v1336_v45  ;;  %vm1273_vm10 = vcmp.gt.f32.partialorder %v1155_v35, 0.0  ;;  %v1391_v51 = vmul.f32 %v2803_v14, %v1352_v47  ;;  %vm1289_vm11 = vcmp.gt.f32.partialorder %v1219_v36, 0.0 }
 0x36b   : > { %v2087_v54 = vadd.f32 %v2086_v48, %v2085_v43  ;;  %v2088_v55 = vpop.f32.mrb[10].mxu0  ;;  %v2135_v56 = vadd.f32 %v2134_v49, %v2133_v44  ;;  %v2136_v57 = vpop.f32.mrb[10].mxu1  ;;  %v1337_v58 = vsel %vm1273_vm10, %v1155_v35, %v1305_v40  ;;  %v1353_v1 = vsel %vm1289_vm11, %v1219_v36, %v1321_v42 }
 0x36c   : > { %v2089_v60 = vpop.f32.mrb[11].mxu0  ;;  %v2137_v61 = vpop.f32.mrb[11].mxu1  ;;  %v1412_v62 = vsel %vm1405_vm4, %v1375_v50, 0.0  ;;  %v1376_v0 = vmul.f32 %v2803_v14, %v1337_v58  ;;  %v1460_v7 = vsel %vm1405_vm4, %v1391_v51, 0.0  ;;  %v1392_v17 = vmul.f32 %v2803_v14, %v1353_v1 }
 0x36d   : > { %v1160_v2 = vadd.f32 %v2087_v54, %v2794_v59  ;;  %v1224_v3 = vadd.f32 %v2135_v56, %v2794_v59  ;;  %v2090_v5 = vadd.f32 %v2089_v60, %v2088_v55  ;;  %v2138_v6 = vadd.f32 %v2137_v61, %v2136_v57  ;;  %1413 = vadd.xlane.f32.xlu1 %v1412_v62 }
 0x36e   : > { %1410 = vadd.xlane.f32.xlu0 %v1409_v63  ;;  %v1415_v13 = vsel %vm1405_vm4, %v1376_v0, 0.0  ;;  %v1463_v4 = vsel %vm1405_vm4, %v1392_v17, 0.0 }
 0x36f   : > { %v1306_v8 = vmul.f32 0.2, %v1160_v2  ;;  %v1322_v10 = vmul.f32 0.2, %v1224_v3  ;;  %v1163_v11 = vadd.f32 %v2090_v5, %v2794_v59  ;;  %v1227_v12 = vadd.f32 %v2138_v6, %v2794_v59 }
 0x370   : > { %vm1274_vm12 = vcmp.gt.f32.partialorder %v1160_v2, 0.0  ;;  %vm1290_vm13 = vcmp.gt.f32.partialorder %v1224_v3, 0.0 }
 0x371   : > { %v1307_v18 = vmul.f32 0.2, %v1163_v11  ;;  %v1323_v19 = vmul.f32 0.2, %v1227_v12  ;;  %v2091_v21 = vpop.f32.mrb[12].mxu0  ;;  %1416 = vadd.xlane.f32.xlu1 %v1415_v13  ;;  %v2139_v22 = vpop.f32.mrb[12].mxu1  ;;  %v1338_v23 = vsel %vm1274_vm12, %v1160_v2, %v1306_v8  ;;  %v1354_v24 = vsel %vm1290_vm13, %v1224_v3, %v1322_v10 }
 0x372   : > { %1461 = vadd.xlane.f32.xlu0 %v1460_v7  ;;  %v2092_v27 = vpop.f32.mrb[13].mxu0  ;;  %v2140_v28 = vpop.f32.mrb[13].mxu1  ;;  %v1377_v29 = vmul.f32 %v2803_v14, %v1338_v23  ;;  %vm1275_vm14 = vcmp.gt.f32.partialorder %v1163_v11, 0.0  ;;  %v1393_v30 = vmul.f32 %v2803_v14, %v1354_v24  ;;  %vm1291_vm15 = vcmp.gt.f32.partialorder %v1227_v12, 0.0 }
 0x373   : > { %v2093_v52 = vadd.f32 %v2092_v27, %v2091_v21  ;;  %v2094_v15 = vpop.f32.mrb[14].mxu0  ;;  %v2141_v20 = vadd.f32 %v2140_v28, %v2139_v22  ;;  %v2142_v26 = vpop.f32.mrb[14].mxu1  ;;  %v1339_v41 = vsel %vm1275_vm14, %v1163_v11, %v1307_v18  ;;  %v1355_v25 = vsel %vm1291_vm15, %v1227_v12, %v1323_v19 }
 0x374   : > { %v2095_v46 = vpop.f32.mrb[15].mxu0  ;;  %v2143_v53 = vpop.f32.mrb[15].mxu1  ;;  %v1418_v9 = vsel %vm1405_vm4, %v1377_v29, 0.0  ;;  %v1378_v16 = vmul.f32 %v2803_v14, %v1339_v41  ;;  %v1466_v33 = vsel %vm1405_vm4, %v1393_v30, 0.0  ;;  %v1394_v42 = vmul.f32 %v2803_v14, %v1355_v25 }
 0x375   : > { %v1168_v34 = vadd.f32 %v2093_v52, %v2794_v59  ;;  %v1232_v37 = vadd.f32 %v2141_v20, %v2794_v59  ;;  %v2096_v31 = vadd.f32 %v2095_v46, %v2094_v15  ;;  %v2144_v32 = vadd.f32 %v2143_v53, %v2142_v26  ;;  %1464 = vadd.xlane.f32.xlu1 %v1463_v4 }
 0x376   : > { %1419 = vadd.xlane.f32.xlu0 %v1418_v9  ;;  %v1421_v40 = vsel %vm1405_vm4, %v1378_v16, 0.0  ;;  %v1469_v0 = vsel %vm1405_vm4, %v1394_v42, 0.0 }
 0x377   : > { %v1308_v35 = vmul.f32 0.2, %v1168_v34  ;;  %v1324_v36 = vmul.f32 0.2, %v1232_v37  ;;  %v1171_v38 = vadd.f32 %v2096_v31, %v2794_v59  ;;  %v1235_v39 = vadd.f32 %v2144_v32, %v2794_v59 }
 0x378   : > { %vm1276_vm0 = vcmp.gt.f32.partialorder %v1168_v34, 0.0  ;;  %vm1292_vm1 = vcmp.gt.f32.partialorder %v1232_v37, 0.0 }
 0x379   : > { %v1309_v43 = vmul.f32 0.2, %v1171_v38  ;;  %v1325_v44 = vmul.f32 0.2, %v1235_v39  ;;  %v2097_v45 = vpop.f32.mrb[16].mxu0  ;;  %1422 = vadd.xlane.f32.xlu1 %v1421_v40  ;;  %v2145_v47 = vpop.f32.mrb[16].mxu1  ;;  %v1340_v48 = vsel %vm1276_vm0, %v1168_v34, %v1308_v35  ;;  %v1356_v49 = vsel %vm1292_vm1, %v1232_v37, %v1324_v36 }
 0x37a   : > { %1467 = vadd.xlane.f32.xlu0 %v1466_v33  ;;  %v2098_v50 = vpop.f32.mrb[17].mxu0  ;;  %v2146_v51 = vpop.f32.mrb[17].mxu1  ;;  %v1379_v54 = vmul.f32 %v2803_v14, %v1340_v48  ;;  %vm1277_vm2 = vcmp.gt.f32.partialorder %v1171_v38, 0.0  ;;  %v1395_v55 = vmul.f32 %v2803_v14, %v1356_v49  ;;  %vm1293_vm3 = vcmp.gt.f32.partialorder %v1235_v39, 0.0 }
 0x37b   : > { %v2099_v56 = vadd.f32 %v2098_v50, %v2097_v45  ;;  %v2100_v57 = vpop.f32.mrb[18].mxu0  ;;  %v2147_v58 = vadd.f32 %v2146_v51, %v2145_v47  ;;  %v2148_v60 = vpop.f32.mrb[18].mxu1  ;;  %v1341_v61 = vsel %vm1277_vm2, %v1171_v38, %v1309_v43  ;;  %v1357_v3 = vsel %vm1293_vm3, %v1235_v39, %v1325_v44 }
 0x37c   : > { %v2101_v62 = vpop.f32.mrb[19].mxu0  ;;  %v2149_v63 = vpop.f32.mrb[19].mxu1  ;;  %v1424_v1 = vsel %vm1405_vm4, %v1379_v54, 0.0  ;;  %v1380_v2 = vmul.f32 %v2803_v14, %v1341_v61  ;;  %v1472_v10 = vsel %vm1405_vm4, %v1395_v55, 0.0  ;;  %v1396_v19 = vmul.f32 %v2803_v14, %v1357_v3 }
 0x37d   : > { %v1176_v5 = vadd.f32 %v2099_v56, %v2794_v59  ;;  %v1240_v6 = vadd.f32 %v2147_v58, %v2794_v59  ;;  %v2102_v7 = vadd.f32 %v2101_v62, %v2100_v57  ;;  %v2150_v8 = vadd.f32 %v2149_v63, %v2148_v60  ;;  %1470 = vadd.xlane.f32.xlu1 %v1469_v0 }
 0x37e   : > { %1425 = vadd.xlane.f32.xlu0 %v1424_v1  ;;  %v1427_v18 = vsel %vm1405_vm4, %v1380_v2, 0.0  ;;  %v1475_v16 = vsel %vm1405_vm4, %v1396_v19, 0.0 }
 0x37f   : > { %v1310_v11 = vmul.f32 0.2, %v1176_v5  ;;  %v1326_v12 = vmul.f32 0.2, %v1240_v6  ;;  %v1179_v13 = vadd.f32 %v2102_v7, %v2794_v59  ;;  %v1243_v17 = vadd.f32 %v2150_v8, %v2794_v59 }
 0x380   : > { %vm1278_vm5 = vcmp.gt.f32.partialorder %v1176_v5, 0.0  ;;  %vm1294_vm6 = vcmp.gt.f32.partialorder %v1240_v6, 0.0 }
 0x381   : > { %v1311_v21 = vmul.f32 0.2, %v1179_v13  ;;  %v1327_v22 = vmul.f32 0.2, %v1243_v17  ;;  %v2103_v23 = vpop.f32.mrb[20].mxu0  ;;  %1428 = vadd.xlane.f32.xlu1 %v1427_v18  ;;  %v2151_v24 = vpop.f32.mrb[20].mxu1  ;;  %v1342_v27 = vsel %vm1278_vm5, %v1176_v5, %v1310_v11  ;;  %v1358_v28 = vsel %vm1294_vm6, %v1240_v6, %v1326_v12 }
 0x382   : > { %1473 = vadd.xlane.f32.xlu0 %v1472_v10  ;;  %v2104_v29 = vpop.f32.mrb[21].mxu0  ;;  %v2152_v30 = vpop.f32.mrb[21].mxu1  ;;  %v1381_v52 = vmul.f32 %v2803_v14, %v1342_v27  ;;  %vm1279_vm7 = vcmp.gt.f32.partialorder %v1179_v13, 0.0  ;;  %v1397_v15 = vmul.f32 %v2803_v14, %v1358_v28  ;;  %vm1295_vm8 = vcmp.gt.f32.partialorder %v1243_v17, 0.0 }
 0x383   : > { %v2105_v20 = vadd.f32 %v2104_v29, %v2103_v23  ;;  %v2106_v26 = vpop.f32.mrb[22].mxu0  ;;  %v2153_v41 = vadd.f32 %v2152_v30, %v2151_v24  ;;  %v2154_v46 = vpop.f32.mrb[22].mxu1  ;;  %v1343_v53 = vsel %vm1279_vm7, %v1179_v13, %v1311_v21  ;;  %v1359_v37 = vsel %vm1295_vm8, %v1243_v17, %v1327_v22 }
 0x384   : > { %v2107_v4 = vpop.f32.mrb[23].mxu0  ;;  %v2155_v9 = vpop.f32.mrb[23].mxu1  ;;  %v1430_v25 = vsel %vm1405_vm4, %v1381_v52, 0.0  ;;  %v1382_v34 = vmul.f32 %v2803_v14, %v1343_v53  ;;  %v1478_v36 = vsel %vm1405_vm4, %v1397_v15, 0.0  ;;  %v1398_v44 = vmul.f32 %v2803_v14, %v1359_v37 }
 0x385   : > { %v1184_v31 = vadd.f32 %v2105_v20, %v2794_v59  ;;  %v1248_v32 = vadd.f32 %v2153_v41, %v2794_v59  ;;  %v2108_v33 = vadd.f32 %v2107_v4, %v2106_v26  ;;  %v2156_v35 = vadd.f32 %v2155_v9, %v2154_v46  ;;  %1476 = vadd.xlane.f32.xlu1 %v1475_v16 }
 0x386   : > { %1431 = vadd.xlane.f32.xlu0 %v1430_v25  ;;  %v1433_v43 = vsel %vm1405_vm4, %v1382_v34, 0.0  ;;  %v1481_v2 = vsel %vm1405_vm4, %v1398_v44, 0.0 }
 0x387   : > { %v1312_v38 = vmul.f32 0.2, %v1184_v31  ;;  %v1328_v39 = vmul.f32 0.2, %v1248_v32  ;;  %v1187_v40 = vadd.f32 %v2108_v33, %v2794_v59  ;;  %v1251_v42 = vadd.f32 %v2156_v35, %v2794_v59 }
 0x388   : > { %vm1280_vm9 = vcmp.gt.f32.partialorder %v1184_v31, 0.0  ;;  %vm1296_vm10 = vcmp.gt.f32.partialorder %v1248_v32, 0.0 }
 0x389   : > { %v1313_v45 = vmul.f32 0.2, %v1187_v40  ;;  %v1329_v47 = vmul.f32 0.2, %v1251_v42  ;;  %v2109_v48 = vpop.f32.mrb[24].mxu0  ;;  %1434 = vadd.xlane.f32.xlu1 %v1433_v43  ;;  %v2157_v49 = vpop.f32.mrb[24].mxu1  ;;  %v1344_v50 = vsel %vm1280_vm9, %v1184_v31, %v1312_v38  ;;  %v1360_v51 = vsel %vm1296_vm10, %v1248_v32, %v1328_v39 }
 0x38a   : > { %1479 = vadd.xlane.f32.xlu0 %v1478_v36  ;;  %v2110_v54 = vpop.f32.mrb[25].mxu0  ;;  %v2158_v55 = vpop.f32.mrb[25].mxu1  ;;  %v1383_v56 = vmul.f32 %v2803_v14, %v1344_v50  ;;  %vm1281_vm11 = vcmp.gt.f32.partialorder %v1187_v40, 0.0  ;;  %v1399_v57 = vmul.f32 %v2803_v14, %v1360_v51  ;;  %vm1297_vm12 = vcmp.gt.f32.partialorder %v1251_v42, 0.0 }
 0x38b   : > { %v2111_v58 = vadd.f32 %v2110_v54, %v2109_v48  ;;  %v2112_v60 = vpop.f32.mrb[26].mxu0  ;;  %v2159_v61 = vadd.f32 %v2158_v55, %v2157_v49  ;;  %v2160_v62 = vpop.f32.mrb[26].mxu1  ;;  %v1345_v63 = vsel %vm1281_vm11, %v1187_v40, %v1313_v45  ;;  %v1361_v6 = vsel %vm1297_vm12, %v1251_v42, %v1329_v47 }
 0x38c   : > { %v2113_v0 = vpop.f32.mrb[27].mxu0  ;;  %v2161_v1 = vpop.f32.mrb[27].mxu1  ;;  %v1436_v3 = vsel %vm1405_vm4, %v1383_v56, 0.0  ;;  %v1384_v5 = vmul.f32 %v2803_v14, %v1345_v63  ;;  %v1484_v12 = vsel %vm1405_vm4, %v1399_v57, 0.0  ;;  %v1400_v22 = vmul.f32 %v2803_v14, %v1361_v6 }
 0x38d   : > { %v1192_v7 = vadd.f32 %v2111_v58, %v2794_v59  ;;  %v1256_v8 = vadd.f32 %v2159_v61, %v2794_v59  ;;  %v2114_v10 = vadd.f32 %v2113_v0, %v2112_v60  ;;  %v2162_v11 = vadd.f32 %v2161_v1, %v2160_v62  ;;  %1482 = vadd.xlane.f32.xlu1 %v1481_v2 }
 0x38e   : > { %1437 = vadd.xlane.f32.xlu0 %v1436_v3  ;;  %v1439_v21 = vsel %vm1405_vm4, %v1384_v5, 0.0  ;;  %v1487_v34 = vsel %vm1405_vm4, %v1400_v22, 0.0  ;;  %v2897_v1 = vstv %s1502_s9 }
 0x38f   : > { %v1314_v13 = vmul.f32 0.2, %v1192_v7  ;;  %v1330_v17 = vmul.f32 0.2, %v1256_v8  ;;  %v1195_v18 = vadd.f32 %v2114_v10, %v2794_v59  ;;  %v1259_v19 = vadd.f32 %v2162_v11, %v2794_v59 }
 0x390   : > { %vm1282_vm13 = vcmp.gt.f32.partialorder %v1192_v7, 0.0  ;;  %vm1298_vm14 = vcmp.gt.f32.partialorder %v1256_v8, 0.0 }
 0x391   : > { %v1315_v23 = vmul.f32 0.2, %v1195_v18  ;;  %v1331_v24 = vmul.f32 0.2, %v1259_v19  ;;  %v2115_v27 = vpop.f32.mrb[28].mxu0  ;;  %1440 = vadd.xlane.f32.xlu1 %v1439_v21  ;;  %v2163_v28 = vpop.f32.mrb[28].mxu1  ;;  %v1346_v29 = vsel %vm1282_vm13, %v1192_v7, %v1314_v13  ;;  %v1362_v30 = vsel %vm1298_vm14, %v1256_v8, %v1330_v17 }
 0x392   : > { %1485 = vadd.xlane.f32.xlu0 %v1484_v12  ;;  %v2116_v52 = vpop.f32.mrb[29].mxu0  ;;  %v2164_v15 = vpop.f32.mrb[29].mxu1  ;;  %v1385_v20 = vmul.f32 %v2803_v14, %v1346_v29  ;;  %vm1283_vm15 = vcmp.gt.f32.partialorder %v1195_v18, 0.0  ;;  %v1401_v26 = vmul.f32 %v2803_v14, %v1362_v30  ;;  %vm1299_vm0 = vcmp.gt.f32.partialorder %v1259_v19, 0.0 }
 0x393   : > { %v2117_v41 = vadd.f32 %v2116_v52, %v2115_v27  ;;  %v2118_v46 = vpop.f32.mrb[30].mxu0  ;;  %v2165_v53 = vadd.f32 %v2164_v15, %v2163_v28  ;;  %v2166_v4 = vpop.f32.mrb[30].mxu1  ;;  %v1347_v9 = vsel %vm1283_vm15, %v1195_v18, %v1315_v23  ;;  %v1363_v32 = vsel %vm1299_vm0, %v1259_v19, %v1331_v24 }
 0x394   : > { %v2119_v16 = vpop.f32.mrb[31].mxu0  ;;  %v2167_v25 = vpop.f32.mrb[31].mxu1  ;;  %v1442_v37 = vsel %vm1405_vm4, %v1385_v20, 0.0  ;;  %v1386_v31 = vmul.f32 %v2803_v14, %v1347_v9  ;;  %v1490_v39 = vsel %vm1405_vm4, %v1401_v26, 0.0  ;;  %v1402_v47 = vmul.f32 %v2803_v14, %v1363_v32 }
 0x395   : > { %v1200_v33 = vadd.f32 %v2117_v41, %v2794_v59  ;;  %v1264_v35 = vadd.f32 %v2165_v53, %v2794_v59  ;;  %v2120_v36 = vadd.f32 %v2119_v16, %v2118_v46  ;;  %v2168_v38 = vadd.f32 %v2167_v25, %v2166_v4  ;;  %1488 = vadd.xlane.f32.xlu1 %v1487_v34 }
 0x396   : > { %1443 = vadd.xlane.f32.xlu0 %v1442_v37  ;;  %v1445_v45 = vsel %vm1405_vm4, %v1386_v31, 0.0  ;;  %v1493_v57 = vsel %vm1405_vm4, %v1402_v47, 0.0 }
 0x397   : > { %v1316_v40 = vmul.f32 0.2, %v1200_v33  ;;  %v1332_v42 = vmul.f32 0.2, %v1264_v35  ;;  %v1203_v43 = vadd.f32 %v2120_v36, %v2794_v59  ;;  %v1267_v44 = vadd.f32 %v2168_v38, %v2794_v59 }
 0x398   : > { %vm1284_vm1 = vcmp.gt.f32.partialorder %v1200_v33, 0.0  ;;  %vm1300_vm2 = vcmp.gt.f32.partialorder %v1264_v35, 0.0 }
 0x399   : > { %v1317_v48 = vmul.f32 0.2, %v1203_v43  ;;  %v1333_v49 = vmul.f32 0.2, %v1267_v44  ;;  %1446 = vadd.xlane.f32.xlu1 %v1445_v45  ;;  %v1348_v50 = vsel %vm1284_vm1, %v1200_v33, %v1316_v40  ;;  %vm1285_vm3 = vcmp.gt.f32.partialorder %v1203_v43, 0.0 }
 0x39a   : > { %1491 = vadd.xlane.f32.xlu0 %v1490_v39  ;;  %v1387_v51 = vmul.f32 %v2803_v14, %v1348_v50  ;;  %v1364_v54 = vsel %vm1300_vm2, %v1264_v35, %v1332_v42  ;;  %vm1301_vm5 = vcmp.gt.f32.partialorder %v1267_v44, 0.0 }
 0x39b   : > { %v1349_v55 = vsel %vm1285_vm3, %v1203_v43, %v1317_v48  ;;  %v1403_v56 = vmul.f32 %v2803_v14, %v1364_v54  ;;  %v1365_v59 = vsel %vm1301_vm5, %v1267_v44, %v1333_v49 }
 0x39c   : > { %v1448_v58 = vsel %vm1405_vm4, %v1387_v51, 0.0  ;;  %v1388_v60 = vmul.f32 %v2803_v14, %v1349_v55  ;;  %v1404_v61 = vmul.f32 %v2803_v14, %v1365_v59 }
 0x39d   : > { %1494 = vadd.xlane.f32.xlu1 %v1493_v57  ;;  %v1496_v63 = vsel %vm1405_vm4, %v1403_v56, 0.0 }
 0x39e   : > { %1449 = vadd.xlane.f32.xlu0 %v1448_v58  ;;  %v1499_v62 = vsel %vm1405_vm4, %v1404_v61, 0.0  ;;  %v1451_v0 = vsel %vm1405_vm4, %v1388_v60, 0.0  ;;  %vm1728_vm4 = vcmask 7168  }
 0x3a1   : > { %1452 = vadd.xlane.f32.xlu1 %v1451_v0 }
 0x3a2   : > { %1497 = vadd.xlane.f32.xlu0 %v1496_v63 }
 0x3a5   : > { %1500 = vadd.xlane.f32.xlu1 %v1499_v62 }
 0x3f2   : > { %v1408_v2 = vpop.xlane.xlu0 %1407 }
 0x3f3   : > { %v1504_v3 = vadd.f32 %v2897_v1, %v1408_v2 }
 0x3f4   : > { %v1459_v5 = vpop.xlane.xlu1 %1458 }
 0x3f5   : > { %v1890_v6 = vmul.f32 -1.442695, %v1504_v3  ;;  %v1521_v14 = vadd.f32 %v2897_v1, %v1459_v5 }
 0x3f6   : > { %v1456_v7 = vpop.xlane.xlu0 %1455 }
 0x3f7   : > { %2300 = vpow2.f32 %v1890_v6  ;;  %v1907_v8 = vmul.f32 -1.442695, %v1521_v14  ;;  %v1520_v10 = vadd.f32 %v2897_v1, %v1456_v7 }
 0x3f9   : > { %2302 = vpow2.f32 %v1907_v8  ;;  %v1906_v11 = vmul.f32 -1.442695, %v1520_v10 }
 0x3fa   : > { %v1414_v12 = vpop.xlane.xlu1 %1413 }
 0x3fb   : > { %2304 = vpow2.f32 %v1906_v11  ;;  %v1506_v13 = vadd.f32 %v2897_v1, %v1414_v12  ;;  %v1411_v17 = vpop.xlane.xlu0 %1410 }
 0x3fc   : > { %v1505_v18 = vadd.f32 %v2897_v1, %v1411_v17 }
 0x3fd   : > { %v1892_v19 = vmul.f32 -1.442695, %v1506_v13 }
 0x3fe   : > { %v1891_v21 = vmul.f32 -1.442695, %v1505_v18  ;;  %v1417_v22 = vpop.xlane.xlu1 %1416 }
 0x3ff   : > { %2306 = vpow2.f32 %v1892_v19  ;;  %v1507_v23 = vadd.f32 %v2897_v1, %v1417_v22  ;;  %v1462_v24 = vpop.xlane.xlu0 %1461 }
 0x400   : > { %2308 = vpow2.f32 %v1891_v21  ;;  %v1522_v27 = vadd.f32 %v2897_v1, %v1462_v24 }
 0x401   : > { %v2301_v28 = vpop.eup %2300  ;;  %v1893_v29 = vmul.f32 -1.442695, %v1507_v23 }
 0x402   : > { %v1632_v30 = vadd.f32 1.0, %v2301_v28  ;;  %v1908_v52 = vmul.f32 -1.442695, %v1522_v27  ;;  %v1465_v15 = vpop.xlane.xlu1 %1464 }
 0x403   : > { %v2303_v20 = vpop.eup %2302  ;;  %2310 = vpow2.f32 %v1893_v29  ;;  %v1523_v26 = vadd.f32 %v2897_v1, %v1465_v15  ;;  %v1420_v41 = vpop.xlane.xlu0 %1419 }
 0x404   : > { %2312 = vrcp.f32 %v1632_v30  ;;  %v1649_v46 = vadd.f32 1.0, %v2303_v20  ;;  %v1508_v53 = vadd.f32 %v2897_v1, %v1420_v41 }
 0x405   : > { %v2305_v4 = vpop.eup %2304  ;;  %2314 = vpow2.f32 %v1908_v52  ;;  %v1909_v9 = vmul.f32 -1.442695, %v1523_v26 }
 0x406   : > { %2316 = vrcp.f32 %v1649_v46  ;;  %v1648_v16 = vadd.f32 1.0, %v2305_v4  ;;  %v1894_v25 = vmul.f32 -1.442695, %v1508_v53  ;;  %v1423_v34 = vpop.xlane.xlu1 %1422 }
 0x407   : > { %2318 = vpow2.f32 %v1909_v9  ;;  %v1509_v37 = vadd.f32 %v2897_v1, %v1423_v34  ;;  %v1468_v31 = vpop.xlane.xlu0 %1467 }
 0x408   : > { %2320 = vrcp.f32 %v1648_v16  ;;  %v1524_v32 = vadd.f32 %v2897_v1, %v1468_v31 }
 0x409   : > { %v2307_v33 = vpop.eup %2306  ;;  %2322 = vpow2.f32 %v1894_v25  ;;  %v1895_v35 = vmul.f32 -1.442695, %v1509_v37 }
 0x40a   : > { %v2309_v36 = vpop.eup %2308  ;;  %v1634_v38 = vadd.f32 1.0, %v2307_v33  ;;  %v1910_v39 = vmul.f32 -1.442695, %v1524_v32  ;;  %v1471_v40 = vpop.xlane.xlu1 %1470 }
 0x40b   : > { %v1633_v42 = vadd.f32 1.0, %v2309_v36  ;;  %2324 = vpow2.f32 %v1895_v35  ;;  %v1525_v43 = vadd.f32 %v2897_v1, %v1471_v40  ;;  %v1426_v44 = vpop.xlane.xlu0 %1425 }
 0x40c   : > { %2326 = vrcp.f32 %v1634_v38  ;;  %v1510_v45 = vadd.f32 %v2897_v1, %v1426_v44 }
 0x40d   : > { %v2311_v47 = vpop.eup %2310  ;;  %2328 = vrcp.f32 %v1633_v42  ;;  %v1911_v48 = vmul.f32 -1.442695, %v1525_v43 }
 0x40e   : > { %v2313_v49 = vpop.eup %2312  ;;  %v1635_v50 = vadd.f32 1.0, %v2311_v47  ;;  %2330 = vpow2.f32 %v1910_v39  ;;  %v1896_v51 = vmul.f32 -1.442695, %v1510_v45  ;;  %v1429_v54 = vpop.xlane.xlu1 %1428 }
 0x40f   : > { %v2315_v55 = vpop.eup %2314  ;;  %1729 = vst.msk [vmem:[%s2534_s10] sm:$0xff] %vm1728_vm4, %v2313_v49  ;;  %2332 = vpow2.f32 %v1911_v48  ;;  %v1511_v56 = vadd.f32 %v2897_v1, %v1429_v54  ;;  %v1474_v59 = vpop.xlane.xlu0 %1473 }
 0x410   : > { %v2317_v57 = vpop.eup %2316  ;;  %2334 = vrcp.f32 %v1635_v50  ;;  %v1650_v58 = vadd.f32 1.0, %v2315_v55  ;;  %v1526_v60 = vadd.f32 %v2897_v1, %v1474_v59 }
 0x411   : > { %v2319_v61 = vpop.eup %2318  ;;  %1746 = vst.msk [vmem:[%s2534_s10 + $0x88] sm:$0xff] %vm1728_vm4, %v2317_v57  ;;  %2336 = vpow2.f32 %v1896_v51  ;;  %v1897_v62 = vmul.f32 -1.442695, %v1511_v56 }
 0x412   : > { %v2321_v63 = vpop.eup %2320  ;;  %2338 = vrcp.f32 %v1650_v58  ;;  %v1651_v0 = vadd.f32 1.0, %v2319_v61  ;;  %v1912_v2 = vmul.f32 -1.442695, %v1526_v60  ;;  %v1477_v3 = vpop.xlane.xlu1 %1476 }
 0x413   : > { %v2323_v5 = vpop.eup %2322  ;;  %1745 = vst.msk [vmem:[%s2534_s10 + $0x80] sm:$0xff] %vm1728_vm4, %v2321_v63  ;;  %2340 = vpow2.f32 %v1897_v62  ;;  %v1527_v6 = vadd.f32 %v2897_v1, %v1477_v3  ;;  %v1432_v14 = vpop.xlane.xlu0 %1431 }
 0x414   : > { %2342 = vrcp.f32 %v1651_v0  ;;  %v1636_v7 = vadd.f32 1.0, %v2323_v5  ;;  %v1512_v8 = vadd.f32 %v2897_v1, %v1432_v14 }
 0x415   : > { %v2325_v10 = vpop.eup %2324  ;;  %2344 = vpow2.f32 %v1912_v2  ;;  %v1913_v11 = vmul.f32 -1.442695, %v1527_v6 }
 0x416   : > { %v2327_v12 = vpop.eup %2326  ;;  %2346 = vrcp.f32 %v1636_v7  ;;  %v1637_v13 = vadd.f32 1.0, %v2325_v10  ;;  %v1898_v17 = vmul.f32 -1.442695, %v1512_v8  ;;  %v1435_v18 = vpop.xlane.xlu1 %1434 }
 0x417   : > { %v2329_v19 = vpop.eup %2328  ;;  %1731 = vst.msk [vmem:[%s2534_s10 + $0x10] sm:$0xff] %vm1728_vm4, %v2327_v12  ;;  %2348 = vpow2.f32 %v1913_v11  ;;  %v1513_v21 = vadd.f32 %v2897_v1, %v1435_v18  ;;  %v1480_v22 = vpop.xlane.xlu0 %1479 }
 0x418   : > { %v2331_v23 = vpop.eup %2330  ;;  %1730 = vst.msk [vmem:[%s2534_s10 + $0x8] sm:$0xff] %vm1728_vm4, %v2329_v19  ;;  %2350 = vrcp.f32 %v1637_v13  ;;  %v1528_v24 = vadd.f32 %v2897_v1, %v1480_v22 }
 0x419   : > { %v2333_v27 = vpop.eup %2332  ;;  %v1652_v28 = vadd.f32 1.0, %v2331_v23  ;;  %2352 = vpow2.f32 %v1898_v17  ;;  %v1899_v29 = vmul.f32 -1.442695, %v1513_v21 }
 0x41a   : > { %v2335_v30 = vpop.eup %2334  ;;  %v1653_v52 = vadd.f32 1.0, %v2333_v27  ;;  %v1483_v15 = vpop.xlane.xlu1 %1482  ;;  %v1914_v26 = vmul.f32 -1.442695, %v1528_v24 }
 0x41b   : > { %v2337_v20 = vpop.eup %2336  ;;  %1732 = vst.msk [vmem:[%s2534_s10 + $0x18] sm:$0xff] %vm1728_vm4, %v2335_v30  ;;  %2354 = vrcp.f32 %v1652_v28  ;;  %v1529_v41 = vadd.f32 %v2897_v1, %v1483_v15  ;;  %v1438_v46 = vpop.xlane.xlu0 %1437 }
 0x41c   : > { %v2339_v53 = vpop.eup %2338  ;;  %2356 = vrcp.f32 %v1653_v52  ;;  %v1638_v4 = vadd.f32 1.0, %v2337_v20  ;;  %v1514_v9 = vadd.f32 %v2897_v1, %v1438_v46 }
 0x41d   : > { %v2341_v16 = vpop.eup %2340  ;;  %1747 = vst.msk [vmem:[%s2534_s10 + $0x90] sm:$0xff] %vm1728_vm4, %v2339_v53  ;;  %2358 = vpow2.f32 %v1899_v29  ;;  %v1915_v25 = vmul.f32 -1.442695, %v1529_v41 }
 0x41e   : > { %v2343_v34 = vpop.eup %2342  ;;  %2360 = vrcp.f32 %v1638_v4  ;;  %v1639_v37 = vadd.f32 1.0, %v2341_v16  ;;  %v1441_v31 = vpop.xlane.xlu1 %1440  ;;  %v1900_v33 = vmul.f32 -1.442695, %v1514_v9 }
 0x41f   : > { %v2345_v32 = vpop.eup %2344  ;;  %1748 = vst.msk [vmem:[%s2534_s10 + $0x98] sm:$0xff] %vm1728_vm4, %v2343_v34  ;;  %2362 = vpow2.f32 %v1914_v26  ;;  %v1515_v35 = vadd.f32 %v2897_v1, %v1441_v31  ;;  %v1486_v36 = vpop.xlane.xlu0 %1485 }
 0x420   : > { %v2347_v38 = vpop.eup %2346  ;;  %2364 = vrcp.f32 %v1639_v37  ;;  %v1654_v39 = vadd.f32 1.0, %v2345_v32  ;;  %v1530_v40 = vadd.f32 %v2897_v1, %v1486_v36 }
 0x421   : > { %v2349_v42 = vpop.eup %2348  ;;  %1733 = vst.msk [vmem:[%s2534_s10 + $0x20] sm:$0xff] %vm1728_vm4, %v2347_v38  ;;  %2366 = vpow2.f32 %v1915_v25  ;;  %v1901_v43 = vmul.f32 -1.442695, %v1515_v35 }
 0x422   : > { %v2351_v44 = vpop.eup %2350  ;;  %2368 = vrcp.f32 %v1654_v39  ;;  %v1655_v45 = vadd.f32 1.0, %v2349_v42  ;;  %v1489_v47 = vpop.xlane.xlu1 %1488  ;;  %v1916_v49 = vmul.f32 -1.442695, %v1530_v40 }
 0x423   : > { %v2353_v48 = vpop.eup %2352  ;;  %1734 = vst.msk [vmem:[%s2534_s10 + $0x28] sm:$0xff] %vm1728_vm4, %v2351_v44  ;;  %2370 = vpow2.f32 %v1900_v33  ;;  %v1531_v50 = vadd.f32 %v2897_v1, %v1489_v47  ;;  %v1444_v51 = vpop.xlane.xlu0 %1443 }
 0x424   : > { %2372 = vrcp.f32 %v1655_v45  ;;  %v1640_v54 = vadd.f32 1.0, %v2353_v48  ;;  %v1516_v55 = vadd.f32 %v2897_v1, %v1444_v51 }
 0x425   : > { %v2355_v56 = vpop.eup %2354  ;;  %2374 = vpow2.f32 %v1901_v43  ;;  %v1917_v59 = vmul.f32 -1.442695, %v1531_v50 }
 0x426   : > { %v2357_v57 = vpop.eup %2356  ;;  %1749 = vst.msk [vmem:[%s2534_s10 + $0xa0] sm:$0xff] %vm1728_vm4, %v2355_v56  ;;  %2376 = vrcp.f32 %v1640_v54  ;;  %v1902_v58 = vmul.f32 -1.442695, %v1516_v55  ;;  %v1447_v60 = vpop.xlane.xlu1 %1446 }
 0x427   : > { %v2359_v61 = vpop.eup %2358  ;;  %1750 = vst.msk [vmem:[%s2534_s10 + $0xa8] sm:$0xff] %vm1728_vm4, %v2357_v57  ;;  %2378 = vpow2.f32 %v1916_v49  ;;  %v1517_v62 = vadd.f32 %v2897_v1, %v1447_v60  ;;  %v1492_v63 = vpop.xlane.xlu0 %1491 }
 0x428   : > { %v2361_v0 = vpop.eup %2360  ;;  %v1641_v2 = vadd.f32 1.0, %v2359_v61  ;;  %2380 = vpow2.f32 %v1917_v59  ;;  %v1532_v3 = vadd.f32 %v2897_v1, %v1492_v63 }
 0x429   : > { %v2363_v5 = vpop.eup %2362  ;;  %1735 = vst.msk [vmem:[%s2534_s10 + $0x30] sm:$0xff] %vm1728_vm4, %v2361_v0  ;;  %2382 = vpow2.f32 %v1902_v58  ;;  %v1903_v6 = vmul.f32 -1.442695, %v1517_v62 }
 0x42a   : > { %v2365_v14 = vpop.eup %2364  ;;  %2384 = vrcp.f32 %v1641_v2  ;;  %v1656_v7 = vadd.f32 1.0, %v2363_v5  ;;  %v1918_v8 = vmul.f32 -1.442695, %v1532_v3  ;;  %v1495_v10 = vpop.xlane.xlu1 %1494 }
 0x42b   : > { %v2367_v11 = vpop.eup %2366  ;;  %1736 = vst.msk [vmem:[%s2534_s10 + $0x38] sm:$0xff] %vm1728_vm4, %v2365_v14  ;;  %2386 = vpow2.f32 %v1903_v6  ;;  %v1533_v12 = vadd.f32 %v2897_v1, %v1495_v10  ;;  %v1450_v13 = vpop.xlane.xlu0 %1449 }
 0x42c   : > { %v2369_v17 = vpop.eup %2368  ;;  %2388 = vrcp.f32 %v1656_v7  ;;  %v1657_v18 = vadd.f32 1.0, %v2367_v11  ;;  %v1518_v19 = vadd.f32 %v2897_v1, %v1450_v13 }
 0x42d   : > { %v2371_v21 = vpop.eup %2370  ;;  %1751 = vst.msk [vmem:[%s2534_s10 + $0xb0] sm:$0xff] %vm1728_vm4, %v2369_v17  ;;  %2390 = vpow2.f32 %v1918_v8  ;;  %v1919_v22 = vmul.f32 -1.442695, %v1533_v12 }
 0x42e   : > { %v2373_v23 = vpop.eup %2372  ;;  %2392 = vrcp.f32 %v1657_v18  ;;  %v1642_v24 = vadd.f32 1.0, %v2371_v21  ;;  %v1904_v27 = vmul.f32 -1.442695, %v1518_v19  ;;  %v1453_v28 = vpop.xlane.xlu1 %1452 }
 0x42f   : > { %v2375_v29 = vpop.eup %2374  ;;  %1752 = vst.msk [vmem:[%s2534_s10 + $0xb8] sm:$0xff] %vm1728_vm4, %v2373_v23  ;;  %2394 = vpow2.f32 %v1919_v22  ;;  %v1519_v30 = vadd.f32 %v2897_v1, %v1453_v28  ;;  %v1498_v52 = vpop.xlane.xlu0 %1497 }
 0x430   : > { %v2377_v15 = vpop.eup %2376  ;;  %2396 = vrcp.f32 %v1642_v24  ;;  %v1643_v20 = vadd.f32 1.0, %v2375_v29  ;;  %v1534_v26 = vadd.f32 %v2897_v1, %v1498_v52 }
 0x431   : > { %v2379_v41 = vpop.eup %2378  ;;  %1737 = vst.msk [vmem:[%s2534_s10 + $0x40] sm:$0xff] %vm1728_vm4, %v2377_v15  ;;  %2398 = vpow2.f32 %v1904_v27  ;;  %v1905_v46 = vmul.f32 -1.442695, %v1519_v30 }
 0x432   : > { %v2381_v53 = vpop.eup %2380  ;;  %2400 = vrcp.f32 %v1643_v20  ;;  %v1658_v4 = vadd.f32 1.0, %v2379_v41  ;;  %v1501_v9 = vpop.xlane.xlu1 %1500  ;;  %v1920_v34 = vmul.f32 -1.442695, %v1534_v26 }
 0x433   : > { %v2383_v16 = vpop.eup %2382  ;;  %v1659_v25 = vadd.f32 1.0, %v2381_v53  ;;  %2402 = vpow2.f32 %v1905_v46  ;;  %v1535_v37 = vadd.f32 %v2897_v1, %v1501_v9 }
 0x434   : > { %v2385_v31 = vpop.eup %2384  ;;  %2404 = vrcp.f32 %v1658_v4  ;;  %v1644_v32 = vadd.f32 1.0, %v2383_v16 }
 0x435   : > { %v2387_v33 = vpop.eup %2386  ;;  %1738 = vst.msk [vmem:[%s2534_s10 + $0x48] sm:$0xff] %vm1728_vm4, %v2385_v31  ;;  %2406 = vrcp.f32 %v1659_v25  ;;  %v1921_v35 = vmul.f32 -1.442695, %v1535_v37 }
 0x436   : > { %v2389_v36 = vpop.eup %2388  ;;  %2408 = vrcp.f32 %v1644_v32  ;;  %v1645_v38 = vadd.f32 1.0, %v2387_v33 }
 0x437   : > { %v2391_v39 = vpop.eup %2390  ;;  %1753 = vst.msk [vmem:[%s2534_s10 + $0xc0] sm:$0xff] %vm1728_vm4, %v2389_v36  ;;  %2410 = vpow2.f32 %v1920_v34 }
 0x438   : > { %v2393_v40 = vpop.eup %2392  ;;  %2412 = vrcp.f32 %v1645_v38  ;;  %v1660_v1 = vadd.f32 1.0, %v2391_v39 }
 0x439   : > { %v2395_v42 = vpop.eup %2394  ;;  %1754 = vst.msk [vmem:[%s2534_s10 + $0xc8] sm:$0xff] %vm1728_vm4, %v2393_v40  ;;  %2414 = vpow2.f32 %v1921_v35 }
 0x43a   : > { %v2397_v43 = vpop.eup %2396  ;;  %2416 = vrcp.f32 %v1660_v1  ;;  %v1661_v44 = vadd.f32 1.0, %v2395_v42 }
 0x43b   : > { %v2399_v45 = vpop.eup %2398  ;;  %1739 = vst.msk [vmem:[%s2534_s10 + $0x50] sm:$0xff] %vm1728_vm4, %v2397_v43 }
 0x43c   : > { %v2401_v47 = vpop.eup %2400  ;;  %2418 = vrcp.f32 %v1661_v44  ;;  %v1646_v48 = vadd.f32 1.0, %v2399_v45 }
 0x43d   : > { %v2403_v49 = vpop.eup %2402  ;;  %1740 = vst.msk [vmem:[%s2534_s10 + $0x58] sm:$0xff] %vm1728_vm4, %v2401_v47 }
 0x43e   : > { %v2405_v50 = vpop.eup %2404  ;;  %2420 = vrcp.f32 %v1646_v48  ;;  %v1647_v51 = vadd.f32 1.0, %v2403_v49 }
 0x43f   : > { %v2407_v54 = vpop.eup %2406  ;;  %1755 = vst.msk [vmem:[%s2534_s10 + $0xd0] sm:$0xff] %vm1728_vm4, %v2405_v50 }
 0x440   : > { %v2409_v55 = vpop.eup %2408  ;;  %1756 = vst.msk [vmem:[%s2534_s10 + $0xd8] sm:$0xff] %vm1728_vm4, %v2407_v54  ;;  %2422 = vrcp.f32 %v1647_v51 }
 0x441   : > { %v2411_v56 = vpop.eup %2410  ;;  %1741 = vst.msk [vmem:[%s2534_s10 + $0x60] sm:$0xff] %vm1728_vm4, %v2409_v55 }
 0x442   : > { %v2413_v59 = vpop.eup %2412  ;;  %v1662_v57 = vadd.f32 1.0, %v2411_v56 }
 0x443   : > { %v2415_v58 = vpop.eup %2414  ;;  %1742 = vst.msk [vmem:[%s2534_s10 + $0x68] sm:$0xff] %vm1728_vm4, %v2413_v59 }
 0x444   : > { %v2417_v60 = vpop.eup %2416  ;;  %2424 = vrcp.f32 %v1662_v57  ;;  %v1663_v61 = vadd.f32 1.0, %v2415_v58 }
 0x445   : > { %1757 = vst.msk [vmem:[%s2534_s10 + $0xe0] sm:$0xff] %vm1728_vm4, %v2417_v60 }
 0x446   : > { %v2419_v62 = vpop.eup %2418  ;;  %2426 = vrcp.f32 %v1663_v61 }
 0x447   : > { %1758 = vst.msk [vmem:[%s2534_s10 + $0xe8] sm:$0xff] %vm1728_vm4, %v2419_v62 }
 0x448   : > { %v2421_v63 = vpop.eup %2420 }
 0x449   : > { %1743 = vst.msk [vmem:[%s2534_s10 + $0x70] sm:$0xff] %vm1728_vm4, %v2421_v63 }
 0x44a   : > { %v2423_v0 = vpop.eup %2422 }
 0x44b   : > { %1744 = vst.msk [vmem:[%s2534_s10 + $0x78] sm:$0xff] %vm1728_vm4, %v2423_v0 }
 0x44e   : > { %v2425_v2 = vpop.eup %2424 }
 0x44f   : > { %1759 = vst.msk [vmem:[%s2534_s10 + $0xf0] sm:$0xff] %vm1728_vm4, %v2425_v2 }
 0x450   : > { %v2427_v3 = vpop.eup %2426 }
 0x451   : > { %1760 = vst.msk [vmem:[%s2534_s10 + $0xf8] sm:$0xff] %vm1728_vm4, %v2427_v3 }
 0x452 PF: > { %s18_s28 = sadd.s32 1, %s2454_s28   ;;  %s3012_s26 = smov %s2450_s27 }
 0x453   : > { %p15_p8 = scmp.ge.s32.totalorder %s18_s28, 4   ;;  %s3013_s27 = smov %s3015_s6 }
 0x455   :  { %17 = sbr.rel (!%p15_p8) target bundleno = 2 (0x2), region = 94 }
 0x45c   :  { %1791 = vsyncmov [#allocation4] }
 0x45f   :  { %s1792_s11 = vpop.sfrf %1791 }
 0x460   :  { %p1924_p9 = scmp.ne.s32.totalorder %s1792_s11, 0 }
 0x462   :  { %1796 = shalt.err (%p1924_p9)  }

</bundles_post_ra>
